<compile_context>
chip_gen: v7x
topology: tpu7x:2x2x1
jax: 0.10.0
libtpu: 0.0.40
codegen_flags: <defaults>
</compile_context>

<pallas_src>
import functools
import math

import jax
import jax.numpy as jnp
from jax.experimental import pallas as pl
from jax.experimental.pallas import tpu as pltpu


# ---------------------------------------------------------------------------
# Layout helpers
# ---------------------------------------------------------------------------

def _round_up(x, m):
    return ((x + m - 1) // m) * m


def head_layout(P, Ncls, V):
    """128-lane-aligned segment layout for the fused head matmul / output slab."""
    Vp = _round_up(max(V, 64), 64)          # padded vocab width
    o_cls = P * Vp                          # txt segment: [0, o_cls)
    assert o_cls % 128 == 0, "choose Vp so that P*Vp is a multiple of 128"
    o_ctrl = o_cls + _round_up(P * Ncls, 128)
    o_bd = o_ctrl + _round_up(P * 2, 128)
    total = o_bd + _round_up(P * 4, 128)
    assert (o_bd - o_ctrl) == (total - o_bd)        # shared even/odd multiplier
    assert (o_ctrl - o_cls) >= P + 16               # misc region fits recs+scores+labels
    return Vp, o_cls, o_ctrl, o_bd, total


# ---------------------------------------------------------------------------
# Pallas kernel (fully fused forward, one grid step per image)
# ---------------------------------------------------------------------------

def _argmax_last(x):
    """First-occurrence argmax over last dim, keepdims, via max + iota + min."""
    m = jnp.max(x, axis=-1, keepdims=True)
    idx = jax.lax.broadcasted_iota(jnp.int32, x.shape, x.ndim - 1)
    cand = jnp.where(x == m, idx, jnp.int32(x.shape[-1]))
    return jnp.min(cand, axis=-1, keepdims=True)


def _fused_kernel(scales_ref, patches_ref, wp_ref, bp_ref, pos_ref, query_ref,
                  wh_ref, bh_ref, out_ref,
                  *, Q, P, Ncls, Vp, o_cls, o_ctrl, o_bd, seg_w, inv_sqrt_d):
    b = pl.program_id(0)

    # --- backbone stand-in: stride-p patch-embed conv as one bf16 MXU matmul
    #     (pixel (x-mean)/std normalization folded into wp/bp; f32 accumulate).
    feat = jnp.dot(patches_ref[...], wp_ref[...],
                   preferred_element_type=jnp.float32) + bp_ref[...]        # (HW, D)

    # --- single cross-attention decoder layer for this image (bf16 MXU operands)
    k = (feat + pos_ref[...].astype(jnp.float32)).astype(jnp.bfloat16)
    v = feat.astype(jnp.bfloat16)
    s = jnp.einsum('qd,kd->qk', query_ref[...], k,
                   preferred_element_type=jnp.float32) * inv_sqrt_d
    s = s - jnp.max(s, axis=-1, keepdims=True)
    e = jnp.exp(s)
    p_attn = (e * pl.reciprocal(jnp.sum(e, axis=-1, keepdims=True), approx=True)
              ).astype(jnp.bfloat16)
    hs = jnp.einsum('qk,kd->qd', p_attn, v, preferred_element_type=jnp.float32)

    # --- fused head projection [txt | cls | ctrl | bd], every segment 128-aligned
    heads = jnp.dot(hs.astype(jnp.bfloat16), wh_ref[...],
                    preferred_element_type=jnp.float32) + bh_ref[...]       # (Q, total)

    # --- text head: softmax over the padded vocab (padded lanes carry -1e30 bias
    #     -> exp underflows to 0, so softmax and argmax ignore them exactly).
    t = heads[:, 0:o_cls].reshape(Q, P, Vp)
    t = t - jnp.max(t, axis=-1, keepdims=True)
    et = jnp.exp(t)
    sm = et * pl.reciprocal(jnp.sum(et, axis=-1, keepdims=True), approx=True)
    recs = _argmax_last(sm).reshape(Q, P).astype(jnp.float32)

    # --- class head: prob = cls.mean(-2).sigmoid(); scores, labels = prob.max(-1)
    cls = heads[:, o_cls:o_cls + P * Ncls].reshape(Q, P, Ncls)
    prob = jax.nn.sigmoid(jnp.sum(cls, axis=-2) * (1.0 / P))                # (Q, Ncls)
    scores = jnp.max(prob, axis=-1, keepdims=True)
    labels = _argmax_last(prob).astype(jnp.float32)

    # --- coordinate heads: sigmoid, then fused inference()+detector_postprocess()
    #     scaling. Combined scale is exactly (out_w, out_h); one hoisted even/odd
    #     lane multiplier is shared by ctrl and bd.
    wmul = scales_ref[2 * b]        # out_w for this image (scalar from SMEM)
    hmul = scales_ref[2 * b + 1]    # out_h for this image
    lane = jax.lax.broadcasted_iota(jnp.int32, (Q, seg_w), 1)
    xy_mul = jnp.where(lane % 2 == 0, wmul, hmul)
    ctrl_s = jax.nn.sigmoid(heads[:, o_ctrl:o_ctrl + seg_w]) * xy_mul
    bd_s = jax.nn.sigmoid(heads[:, o_bd:o_bd + seg_w]) * xy_mul

    # --- lane-dense, 128-aligned, full-width stores (no odd-offset concatenate)
    misc_w = o_ctrl - o_cls
    misc = jnp.concatenate(
        [recs,                                              # lanes [0, P)
         jnp.broadcast_to(scores, (Q, 8)),                  # lanes [P, P+8)
         jnp.broadcast_to(labels, (Q, 8)),                  # lanes [P+8, P+16)
         jnp.zeros((Q, misc_w - P - 16), jnp.float32)], axis=-1)
    out_ref[:, 0:o_cls] = sm.reshape(Q, P * Vp)
    out_ref[:, o_cls:o_ctrl] = misc
    out_ref[:, o_ctrl:o_bd] = ctrl_s
    out_ref[:, o_bd:o_bd + seg_w] = bd_s


def fused_forward(scales_flat, patches, w_patch, b_patch, pos, query,
                  w_heads, b_heads, *, B, Q, P, Ncls, Vp, HW, D,
                  o_cls, o_ctrl, o_bd, total):
    seg_w = o_bd - o_ctrl
    kernel = functools.partial(
        _fused_kernel, Q=Q, P=P, Ncls=Ncls, Vp=Vp,
        o_cls=o_cls, o_ctrl=o_ctrl, o_bd=o_bd, seg_w=seg_w,
        inv_sqrt_d=1.0 / math.sqrt(D))
    slab = pl.pallas_call(
        kernel,
        out_shape=jax.ShapeDtypeStruct((B * Q, total), jnp.float32),
        grid=(B,),
        in_specs=[
            pl.BlockSpec(scales_flat.shape, lambda b: (0,),
                         memory_space=pltpu.MemorySpace.SMEM),
            pl.BlockSpec((HW, patches.shape[1]), lambda b: (b, 0)),
            pl.BlockSpec(w_patch.shape, lambda b: (0, 0)),
            pl.BlockSpec(b_patch.shape, lambda b: (0, 0)),
            pl.BlockSpec((HW, D), lambda b: (b, 0)),
            pl.BlockSpec(query.shape, lambda b: (0, 0)),
            pl.BlockSpec(w_heads.shape, lambda b: (0, 0)),
            pl.BlockSpec(b_heads.shape, lambda b: (0, 0)),
        ],
        out_specs=pl.BlockSpec((Q, total), lambda b: (b, 0)),
        compiler_params=pltpu.CompilerParams(
            dimension_semantics=("parallel",)),   # shards over both TCs on v7x
    )(scales_flat, patches, w_patch, b_patch, pos, query, w_heads, b_heads)
    return slab


# ---------------------------------------------------------------------------
# Plain-JAX glue
# ---------------------------------------------------------------------------

@functools.lru_cache(maxsize=None)
def sine_position_encoding(B, H, W, num_pos_feats, temperature=10000.0):
    """PositionalEncoding2D(N_steps, temperature, normalize=True); cached per shape."""
    not_mask = jnp.ones((B, H, W), jnp.float32)   # mask_out_padding: all-valid
    y_embed = jnp.cumsum(not_mask, axis=1)
    x_embed = jnp.cumsum(not_mask, axis=2)
    eps, scale = 1e-6, 2 * math.pi
    y_embed = y_embed / (y_embed[:, -1:, :] + eps) * scale
    x_embed = x_embed / (x_embed[:, :, -1:] + eps) * scale
    dim_t = jnp.arange(num_pos_feats, dtype=jnp.float32)
    dim_t = temperature ** (2.0 * jnp.floor(dim_t / 2.0) / num_pos_feats)
    pos_x = x_embed[..., None] / dim_t
    pos_y = y_embed[..., None] / dim_t
    pos_x = jnp.stack([jnp.sin(pos_x[..., 0::2]), jnp.cos(pos_x[..., 1::2])],
                      axis=4).reshape(B, H, W, -1)
    pos_y = jnp.stack([jnp.sin(pos_y[..., 0::2]), jnp.cos(pos_y[..., 1::2])],
                      axis=4).reshape(B, H, W, -1)
    pos = jnp.concatenate([pos_y, pos_x], axis=3)          # (B,H,W,2*N_steps)
    return pos.reshape(B, H * W, 2 * num_pos_feats)


def init_params(key, C=3, patch=8, hidden=32, num_queries=8, num_points=8,
                num_classes=2, voc_size=37):
    V = voc_size + 1
    ks = jax.random.split(key, 6)

    def w(k, shape, scale=0.02):
        return jax.random.normal(k, shape, jnp.float32) * scale

    return {
        'pixel_mean': jnp.asarray([123.675, 116.28, 103.53], jnp.float32),
        'pixel_std': jnp.asarray([58.395, 57.12, 57.375], jnp.float32),
        'w_patch': w(ks[0], (C * patch * patch, hidden)),
        'b_patch': jnp.zeros((hidden,), jnp.float32),
        'query_embed': w(ks[1], (num_queries, hidden), 1.0),
        'w_cls': w(ks[2], (hidden, num_points * num_classes)),
        'b_cls': jnp.zeros((num_points * num_classes,), jnp.float32),
        'w_ctrl': w(ks[3], (hidden, num_points * 2)),
        'b_ctrl': jnp.zeros((num_points * 2,), jnp.float32),
        'w_txt': w(ks[4], (hidden, num_points * V)),
        'b_txt': jnp.zeros((num_points * V,), jnp.float32),
        'w_bd': w(ks[5], (hidden, num_points * 4)),
        'b_bd': jnp.zeros((num_points * 4,), jnp.float32),
    }


def build_fused_params(params, patch, P, Ncls, V):
    """Fold (x-mean)/std into the patch embed; build bf16, 128-lane-aligned heads."""
    Vp, o_cls, o_ctrl, o_bd, total = head_layout(P, Ncls, V)
    pp = patch * patch
    std_row = jnp.repeat(params['pixel_std'], pp)          # (C*p*p,) channel-major
    mean_row = jnp.repeat(params['pixel_mean'], pp)
    w_patch = (params['w_patch'] / std_row[:, None]).astype(jnp.bfloat16)
    b_patch = (params['b_patch']
               - (mean_row / std_row) @ params['w_patch']).reshape(1, -1)

    D = params['w_patch'].shape[1]

    # txt head: pad V -> Vp with zero weights and -1e30 bias (softmax/argmax safe)
    w_txt = jnp.pad(params['w_txt'].reshape(D, P, V),
                    ((0, 0), (0, 0), (0, Vp - V))).reshape(D, P * Vp)
    b_txt = jnp.pad(params['b_txt'].reshape(P, V),
                    ((0, 0), (0, Vp - V)), constant_values=-1e30).reshape(P * Vp)

    def pad_seg(w_seg, b_seg, width):
        n = width - w_seg.shape[1]
        return jnp.pad(w_seg, ((0, 0), (0, n))), jnp.pad(b_seg, ((0, n),))

    w_cls, b_cls = pad_seg(params['w_cls'], params['b_cls'], o_ctrl - o_cls)
    w_ctrl, b_ctrl = pad_seg(params['w_ctrl'], params['b_ctrl'], o_bd - o_ctrl)
    w_bd, b_bd = pad_seg(params['w_bd'], params['b_bd'], total - o_bd)

    w_heads = jnp.concatenate([w_txt, w_cls, w_ctrl, w_bd],
                              axis=1).astype(jnp.bfloat16)
    b_heads = jnp.concatenate([b_txt, b_cls, b_ctrl, b_bd], axis=0).reshape(1, -1)
    return w_patch, b_patch, w_heads, b_heads


def transformer_pure_detector_forward(params, images_nchw, image_sizes,
                                      output_sizes, cfg):
    B, C, H, W = images_nchw.shape
    p, D = cfg['patch'], cfg['hidden']
    Q, P = cfg['num_queries'], cfg['num_points']
    Ncls, V = cfg['num_classes'], cfg['voc_size'] + 1
    Hf, Wf = H // p, W // p
    HW = Hf * Wf
    Vp, o_cls, o_ctrl, o_bd, total = head_layout(P, Ncls, V)

    # TODO(synk): at real image sizes this patchify transpose is a full extra HBM
    # round trip; feed NHWC upstream or gather patches inside the kernel instead.
    patches = images_nchw.reshape(B, C, Hf, p, Wf, p).transpose(0, 2, 4, 1, 3, 5)
    patches = patches.reshape(B * HW, C * p * p).astype(jnp.bfloat16)

    w_patch, b_patch, w_heads, b_heads = build_fused_params(params, p, P, Ncls, V)
    pos = sine_position_encoding(B, Hf, Wf, D // 2)
    pos = pos.reshape(B * HW, D).astype(jnp.bfloat16)
    query = params['query_embed'].astype(jnp.bfloat16)

    # inference(): x *= img_w, y *= img_h; detector_postprocess(): x *= out_w/img_w,
    # y *= out_h/img_h.  Combined scale is exactly (out_w, out_h) per image.
    srows = []
    for b in range(B):
        oh, ow = output_sizes[b]
        srows += [float(ow), float(oh)]
    scales_flat = jnp.asarray(srows, jnp.float32)          # (2B,) flat -> SMEM

    slab = fused_forward(scales_flat, patches, w_patch, b_patch, pos, query,
                         w_heads, b_heads, B=B, Q=Q, P=P, Ncls=Ncls, Vp=Vp,
                         HW=HW, D=D, o_cls=o_cls, o_ctrl=o_ctrl, o_bd=o_bd,
                         total=total)

    # unpack the lane-dense, 128-aligned result slab
    rec_scores = slab[:, :P * Vp].reshape(B, Q, P, Vp)[..., :V]
    recs = slab[:, o_cls:o_cls + P].astype(jnp.int32).reshape(B, Q, P)
    scores = slab[:, o_cls + P].reshape(B, Q)
    labels = slab[:, o_cls + P + 8].astype(jnp.int32).reshape(B, Q)
    ctrl_s = slab[:, o_ctrl:o_ctrl + P * 2].reshape(B, Q, P * 2)
    bd_s = slab[:, o_bd:o_bd + P * 4].reshape(B, Q, P, 4)

    results = []
    thr = cfg['test_score_threshold']
    for b in range(B):
        keep = scores[b] >= thr
        # TODO(synk): boolean selection (scores >= threshold) produces data-dependent
        # shapes / Instances objects; we return full per-query tensors plus the mask.
        results.append({
            'image_size': image_sizes[b],
            'scores': scores[b],
            'pred_classes': labels[b],
            'rec_scores': rec_scores[b],
            'ctrl_points': ctrl_s[b],
            'recs': recs[b],
            'bd': bd_s[b],
            'keep': keep,
        })
    return results


if __name__ == "__main__":
    key = jax.random.PRNGKey(0)
    B, C, H, W = 2, 3, 32, 32
    cfg = dict(patch=8, hidden=32, num_queries=8, num_points=8,
               num_classes=2, voc_size=37, test_score_threshold=0.4)

    k_img, k_par = jax.random.split(key)
    images = jax.random.uniform(k_img, (B, C, H, W), jnp.float32) * 255.0
    params = init_params(k_par, C=C, patch=cfg['patch'], hidden=cfg['hidden'],
                         num_queries=cfg['num_queries'], num_points=cfg['num_points'],
                         num_classes=cfg['num_classes'], voc_size=cfg['voc_size'])

    image_sizes = [(H, W), (H, W)]          # model-input (unpadded) sizes
    output_sizes = [(48, 64), (H, W)]       # requested output "height"/"width"

    results = transformer_pure_detector_forward(params, images, image_sizes,
                                                output_sizes, cfg)
    jax.block_until_ready(results)
    assert results[0]['scores'].shape == (cfg['num_queries'],)
    assert results[0]['ctrl_points'].shape == (cfg['num_queries'], cfg['num_points'] * 2)
    assert results[0]['rec_scores'].shape == (cfg['num_queries'], cfg['num_points'], cfg['voc_size'] + 1)
    assert results[0]['bd'].shape == (cfg['num_queries'], cfg['num_points'], 4)
    print("KERNEL_OK")
</pallas_src>

<mosaic_0001>
module attributes {stable_mosaic.version = 11 : i64} {
  func.func @_fused_kernel(%arg0: i32, %arg1: memref<4xf32, #tpu.memory_space<smem>>, %arg2: memref<16x192xbf16, #tpu.memory_space<vmem>>, %arg3: memref<192x32xbf16, #tpu.memory_space<vmem>>, %arg4: memref<1x32xf32, #tpu.memory_space<vmem>>, %arg5: memref<16x32xbf16, #tpu.memory_space<vmem>>, %arg6: memref<8x32xbf16, #tpu.memory_space<vmem>>, %arg7: memref<32x896xbf16, #tpu.memory_space<vmem>>, %arg8: memref<1x896xf32, #tpu.memory_space<vmem>>, %arg9: memref<8x896xf32, #tpu.memory_space<vmem>>) attributes {dimension_semantics = [#tpu.dimension_semantics<parallel>], iteration_bounds = array<i64: 2>, scalar_prefetch = 0 : i64, scratch_operands = 0 : i64, tpu.core_type = #tpu.core_type<tc>, window_params = [{transform_indices = @transform_0, window_bounds = array<i64: 4>}, {transform_indices = @transform_1, window_bounds = array<i64: 16, 192>}, {pipeline_mode = #tpu.pipeline_mode<synchronous>, transform_indices = @transform_2, window_bounds = array<i64: 192, 32>}, {pipeline_mode = #tpu.pipeline_mode<synchronous>, transform_indices = @transform_3, window_bounds = array<i64: 1, 32>}, {transform_indices = @transform_4, window_bounds = array<i64: 16, 32>}, {pipeline_mode = #tpu.pipeline_mode<synchronous>, transform_indices = @transform_5, window_bounds = array<i64: 8, 32>}, {pipeline_mode = #tpu.pipeline_mode<synchronous>, transform_indices = @transform_6, window_bounds = array<i64: 32, 896>}, {pipeline_mode = #tpu.pipeline_mode<synchronous>, transform_indices = @transform_7, window_bounds = array<i64: 1, 896>}, {transform_indices = @transform_8, window_bounds = array<i64: 8, 896>}]} {
    %c0 = arith.constant 0 : index
    %c0_0 = arith.constant 0 : index
    %0 = vector.load %arg2[%c0, %c0_0] : memref<16x192xbf16, #tpu.memory_space<vmem>>, vector<16x192xbf16>
    %c0_1 = arith.constant 0 : index
    %c0_2 = arith.constant 0 : index
    %1 = vector.load %arg3[%c0_1, %c0_2] : memref<192x32xbf16, #tpu.memory_space<vmem>>, vector<192x32xbf16>
    %cst = arith.constant dense<0.000000e+00> : vector<16x32xf32>
    %2 = tpu.matmul %0, %1, %cst {dimension_numbers = #tpu.dot_dimension_numbers<[1], [0], [0], [1], [0, 0, 1, 1], [], []>} : vector<16x192xbf16>, vector<192x32xbf16>, vector<16x32xf32> -> vector<16x32xf32>
    %c0_3 = arith.constant 0 : index
    %c0_4 = arith.constant 0 : index
    %3 = vector.load %arg4[%c0_3, %c0_4] : memref<1x32xf32, #tpu.memory_space<vmem>>, vector<1x32xf32>
    %4 = vector.broadcast %3 : vector<1x32xf32> to vector<16x32xf32>
    %5 = arith.addf %2, %4 : vector<16x32xf32>
    %c0_5 = arith.constant 0 : index
    %c0_6 = arith.constant 0 : index
    %6 = vector.load %arg5[%c0_5, %c0_6] : memref<16x32xbf16, #tpu.memory_space<vmem>>, vector<16x32xbf16>
    %7 = arith.extf %6 : vector<16x32xbf16> to vector<16x32xf32>
    %8 = arith.addf %5, %7 : vector<16x32xf32>
    %9 = arith.truncf %8 : vector<16x32xf32> to vector<16x32xbf16>
    %10 = arith.truncf %5 : vector<16x32xf32> to vector<16x32xbf16>
    %c0_7 = arith.constant 0 : index
    %c0_8 = arith.constant 0 : index
    %11 = vector.load %arg6[%c0_7, %c0_8] : memref<8x32xbf16, #tpu.memory_space<vmem>>, vector<8x32xbf16>
    "tpu.trace_start"() <{level = 10 : i32, message = "qd,kd->qk"}> : () -> ()
    %cst_9 = arith.constant dense<0.000000e+00> : vector<8x16xf32>
    %12 = tpu.matmul %11, %9, %cst_9 {dimension_numbers = #tpu.dot_dimension_numbers<[1], [1], [0], [0], [0, 0, 1, 0], [], []>} : vector<8x32xbf16>, vector<16x32xbf16>, vector<8x16xf32> -> vector<8x16xf32>
    "tpu.trace_stop"() : () -> ()
    %cst_10 = arith.constant 0.176776692 : f32
    %13 = vector.broadcast %cst_10 : f32 to vector<8x16xf32>
    %14 = arith.mulf %12, %13 : vector<8x16xf32>
    %cst_11 = arith.constant dense<0xFF800000> : vector<8xf32>
    %15 = vector.multi_reduction <maximumf>, %14, %cst_11 [1] : vector<8x16xf32> to vector<8xf32>
    %16 = vector.shape_cast %15 : vector<8xf32> to vector<8x1xf32>
    %17 = vector.broadcast %16 : vector<8x1xf32> to vector<8x16xf32>
    %18 = arith.subf %14, %17 : vector<8x16xf32>
    %19 = math.exp %18 : vector<8x16xf32>
    %cst_12 = arith.constant dense<0.000000e+00> : vector<8xf32>
    %20 = vector.multi_reduction <add>, %19, %cst_12 [1] : vector<8x16xf32> to vector<8xf32>
    %21 = vector.shape_cast %20 : vector<8xf32> to vector<8x1xf32>
    %22 = tpu.reciprocal %21 {approx = true} : vector<8x1xf32> -> vector<8x1xf32>
    %23 = vector.broadcast %22 : vector<8x1xf32> to vector<8x16xf32>
    %24 = arith.mulf %19, %23 : vector<8x16xf32>
    %25 = arith.truncf %24 : vector<8x16xf32> to vector<8x16xbf16>
    "tpu.trace_start"() <{level = 10 : i32, message = "qk,kd->qd"}> : () -> ()
    %cst_13 = arith.constant dense<0.000000e+00> : vector<8x32xf32>
    %26 = tpu.matmul %25, %10, %cst_13 {dimension_numbers = #tpu.dot_dimension_numbers<[1], [0], [0], [1], [0, 0, 1, 1], [], []>} : vector<8x16xbf16>, vector<16x32xbf16>, vector<8x32xf32> -> vector<8x32xf32>
    "tpu.trace_stop"() : () -> ()
    %27 = arith.truncf %26 : vector<8x32xf32> to vector<8x32xbf16>
    %c0_14 = arith.constant 0 : index
    %c0_15 = arith.constant 0 : index
    %28 = vector.load %arg7[%c0_14, %c0_15] : memref<32x896xbf16, #tpu.memory_space<vmem>>, vector<32x896xbf16>
    %cst_16 = arith.constant dense<0.000000e+00> : vector<8x896xf32>
    %29 = tpu.matmul %27, %28, %cst_16 {dimension_numbers = #tpu.dot_dimension_numbers<[1], [0], [0], [1], [0, 0, 1, 1], [], []>} : vector<8x32xbf16>, vector<32x896xbf16>, vector<8x896xf32> -> vector<8x896xf32>
    %c0_17 = arith.constant 0 : index
    %c0_18 = arith.constant 0 : index
    %30 = vector.load %arg8[%c0_17, %c0_18] : memref<1x896xf32, #tpu.memory_space<vmem>>, vector<1x896xf32>
    %31 = vector.broadcast %30 : vector<1x896xf32> to vector<8x896xf32>
    %32 = arith.addf %29, %31 : vector<8x896xf32>
    %33 = vector.extract_strided_slice %32 {offsets = [0, 0], sizes = [8, 512], strides = [1, 1]} : vector<8x896xf32> to vector<8x512xf32>
    %34 = vector.shape_cast %33 : vector<8x512xf32> to vector<8x8x64xf32>
    %cst_19 = arith.constant dense<0xFF800000> : vector<8x8xf32>
    %35 = vector.multi_reduction <maximumf>, %34, %cst_19 [2] : vector<8x8x64xf32> to vector<8x8xf32>
    %36 = vector.shape_cast %35 : vector<8x8xf32> to vector<8x8x1xf32>
    %37 = vector.broadcast %36 : vector<8x8x1xf32> to vector<8x8x64xf32>
    %38 = arith.subf %34, %37 : vector<8x8x64xf32>
    %39 = math.exp %38 : vector<8x8x64xf32>
    %cst_20 = arith.constant dense<0.000000e+00> : vector<8x8xf32>
    %40 = vector.multi_reduction <add>, %39, %cst_20 [2] : vector<8x8x64xf32> to vector<8x8xf32>
    %41 = vector.shape_cast %40 : vector<8x8xf32> to vector<8x8x1xf32>
    %42 = tpu.reciprocal %41 {approx = true} : vector<8x8x1xf32> -> vector<8x8x1xf32>
    %43 = vector.broadcast %42 : vector<8x8x1xf32> to vector<8x8x64xf32>
    %44 = arith.mulf %39, %43 : vector<8x8x64xf32>
    %cst_21 = arith.constant dense<0xFF800000> : vector<8x8xf32>
    %45 = vector.multi_reduction <maximumf>, %44, %cst_21 [2] : vector<8x8x64xf32> to vector<8x8xf32>
    %46 = vector.shape_cast %45 : vector<8x8xf32> to vector<8x8x1xf32>
    %47 = tpu.iota {dimensions = array<i32: 2>} : vector<8x8x64xi32>
    %48 = vector.broadcast %46 : vector<8x8x1xf32> to vector<8x8x64xf32>
    %49 = arith.cmpf oeq, %44, %48 : vector<8x8x64xf32>
    %c64_i32 = arith.constant 64 : i32
    %50 = vector.broadcast %c64_i32 : i32 to vector<8x8x64xi32>
    %51 = arith.select %49, %47, %50 : vector<8x8x64xi1>, vector<8x8x64xi32>
    %cst_22 = arith.constant dense<2147483647> : vector<8x8xi32>
    %52 = vector.multi_reduction <minsi>, %51, %cst_22 [2] : vector<8x8x64xi32> to vector<8x8xi32>
    %53 = vector.shape_cast %52 : vector<8x8xi32> to vector<8x8x1xi32>
    %54 = vector.shape_cast %53 : vector<8x8x1xi32> to vector<8x8xi32>
    %55 = arith.sitofp %54 : vector<8x8xi32> to vector<8x8xf32>
    %56 = vector.extract_strided_slice %32 {offsets = [0, 512], sizes = [8, 16], strides = [1, 1]} : vector<8x896xf32> to vector<8x16xf32>
    %57 = vector.shape_cast %56 : vector<8x16xf32> to vector<8x8x2xf32>
    %cst_23 = arith.constant dense<0.000000e+00> : vector<8x2xf32>
    %58 = vector.multi_reduction <add>, %57, %cst_23 [1] : vector<8x8x2xf32> to vector<8x2xf32>
    %cst_24 = arith.constant 1.250000e-01 : f32
    %59 = vector.broadcast %cst_24 : f32 to vector<8x2xf32>
    %60 = arith.mulf %58, %59 : vector<8x2xf32>
    %61 = arith.negf %60 : vector<8x2xf32>
    %62 = math.exp %61 : vector<8x2xf32>
    %cst_25 = arith.constant 1.000000e+00 : f32
    %63 = vector.broadcast %cst_25 : f32 to vector<8x2xf32>
    %64 = arith.addf %63, %62 : vector<8x2xf32>
    %65 = arith.divf %63, %64 : vector<8x2xf32>
    %cst_26 = arith.constant dense<0xFF800000> : vector<8xf32>
    %66 = vector.multi_reduction <maximumf>, %65, %cst_26 [1] : vector<8x2xf32> to vector<8xf32>
    %67 = vector.shape_cast %66 : vector<8xf32> to vector<8x1xf32>
    %cst_27 = arith.constant dense<0xFF800000> : vector<8xf32>
    %68 = vector.multi_reduction <maximumf>, %65, %cst_27 [1] : vector<8x2xf32> to vector<8xf32>
    %69 = vector.shape_cast %68 : vector<8xf32> to vector<8x1xf32>
    %70 = tpu.iota {dimensions = array<i32: 1>} : vector<8x2xi32>
    %71 = vector.broadcast %69 : vector<8x1xf32> to vector<8x2xf32>
    %72 = arith.cmpf oeq, %65, %71 : vector<8x2xf32>
    %c2_i32 = arith.constant 2 : i32
    %73 = vector.broadcast %c2_i32 : i32 to vector<8x2xi32>
    %74 = arith.select %72, %70, %73 : vector<8x2xi1>, vector<8x2xi32>
    %cst_28 = arith.constant dense<2147483647> : vector<8xi32>
    %75 = vector.multi_reduction <minsi>, %74, %cst_28 [1] : vector<8x2xi32> to vector<8xi32>
    %76 = vector.shape_cast %75 : vector<8xi32> to vector<8x1xi32>
    %77 = arith.sitofp %76 : vector<8x1xi32> to vector<8x1xf32>
    %c2_i32_29 = arith.constant 2 : i32
    %78 = arith.muli %c2_i32_29, %arg0 : i32
    %79 = arith.index_cast %78 : i32 to index
    %80 = memref.load %arg1[%79] : memref<4xf32, #tpu.memory_space<smem>>
    %c2_i32_30 = arith.constant 2 : i32
    %81 = arith.muli %c2_i32_30, %arg0 : i32
    %c1_i32 = arith.constant 1 : i32
    %82 = arith.addi %81, %c1_i32 : i32
    %83 = arith.index_cast %82 : i32 to index
    %84 = memref.load %arg1[%83] : memref<4xf32, #tpu.memory_space<smem>>
    %85 = tpu.iota {dimensions = array<i32: 1>} : vector<8x128xi32>
    %c2_i32_31 = arith.constant 2 : i32
    %c0_i32 = arith.constant 0 : i32
    %86 = arith.cmpi eq, %c2_i32_31, %c0_i32 : i32
    %c1_i32_32 = arith.constant 1 : i32
    %87 = arith.select %86, %c1_i32_32, %c2_i32_31 : i32
    %88 = vector.broadcast %87 : i32 to vector<8x128xi32>
    %89 = arith.remsi %85, %88 : vector<8x128xi32>
    %c0_i32_33 = arith.constant 0 : i32
    %90 = vector.broadcast %c0_i32_33 : i32 to vector<8x128xi32>
    %91 = arith.cmpi ne, %89, %90 : vector<8x128xi32>
    %c0_i32_34 = arith.constant 0 : i32
    %92 = vector.broadcast %c0_i32_34 : i32 to vector<8x128xi32>
    %93 = arith.cmpi slt, %89, %92 : vector<8x128xi32>
    %c0_i32_35 = arith.constant 0 : i32
    %94 = arith.cmpi slt, %87, %c0_i32_35 : i32
    %95 = vector.broadcast %94 : i1 to vector<8x128xi1>
    %96 = vector.broadcast %95 : vector<8x128xi1> to vector<8x128xi1>
    %97 = arith.xori %93, %96 : vector<8x128xi1>
    %98 = arith.andi %97, %91 : vector<8x128xi1>
    %99 = vector.broadcast %87 : i32 to vector<8x128xi32>
    %100 = arith.addi %89, %99 : vector<8x128xi32>
    %101 = arith.select %98, %100, %89 : vector<8x128xi1>, vector<8x128xi32>
    %c0_i32_36 = arith.constant 0 : i32
    %102 = vector.broadcast %c0_i32_36 : i32 to vector<8x128xi32>
    %103 = arith.cmpi eq, %101, %102 : vector<8x128xi32>
    %104 = vector.broadcast %80 : f32 to vector<8x128xf32>
    %105 = vector.broadcast %84 : f32 to vector<8x128xf32>
    %106 = arith.select %103, %104, %105 : vector<8x128xi1>, vector<8x128xf32>
    %107 = vector.extract_strided_slice %32 {offsets = [0, 640], sizes = [8, 128], strides = [1, 1]} : vector<8x896xf32> to vector<8x128xf32>
    %108 = arith.negf %107 : vector<8x128xf32>
    %109 = math.exp %108 : vector<8x128xf32>
    %cst_37 = arith.constant 1.000000e+00 : f32
    %110 = vector.broadcast %cst_37 : f32 to vector<8x128xf32>
    %111 = arith.addf %110, %109 : vector<8x128xf32>
    %112 = arith.divf %110, %111 : vector<8x128xf32>
    %113 = arith.mulf %112, %106 : vector<8x128xf32>
    %114 = vector.extract_strided_slice %32 {offsets = [0, 768], sizes = [8, 128], strides = [1, 1]} : vector<8x896xf32> to vector<8x128xf32>
    %115 = arith.negf %114 : vector<8x128xf32>
    %116 = math.exp %115 : vector<8x128xf32>
    %cst_38 = arith.constant 1.000000e+00 : f32
    %117 = vector.broadcast %cst_38 : f32 to vector<8x128xf32>
    %118 = arith.addf %117, %116 : vector<8x128xf32>
    %119 = arith.divf %117, %118 : vector<8x128xf32>
    %120 = arith.mulf %119, %106 : vector<8x128xf32>
    %121 = vector.shape_cast %67 : vector<8x1xf32> to vector<8x1xf32>
    %122 = vector.broadcast %121 : vector<8x1xf32> to vector<8x8xf32>
    %123 = vector.shape_cast %77 : vector<8x1xf32> to vector<8x1xf32>
    %124 = vector.broadcast %123 : vector<8x1xf32> to vector<8x8xf32>
    %cst_39 = arith.constant 0.000000e+00 : f32
    %125 = vector.broadcast %cst_39 : f32 to vector<8x104xf32>
    %126 = tpu.concatenate %55, %122, %124, %125 in 1 : vector<8x8xf32>, vector<8x8xf32>, vector<8x8xf32>, vector<8x104xf32> -> vector<8x128xf32>
    %127 = vector.shape_cast %44 : vector<8x8x64xf32> to vector<8x512xf32>
    %c0_40 = arith.constant 0 : index
    %c0_41 = arith.constant 0 : index
    %128 = vector.load %arg9[%c0_40, %c0_41] : memref<8x896xf32, #tpu.memory_space<vmem>>, vector<8x512xf32>
    tpu.vector_store %arg9[%c0_40, %c0_41], %127 {strides = array<i32>} : memref<8x896xf32, #tpu.memory_space<vmem>>, vector<8x512xf32>,
    %c0_42 = arith.constant 0 : index
    %c512 = arith.constant 512 : index
    %129 = vector.load %arg9[%c0_42, %c512] : memref<8x896xf32, #tpu.memory_space<vmem>>, vector<8x128xf32>
    tpu.vector_store %arg9[%c0_42, %c512], %126 {strides = array<i32>} : memref<8x896xf32, #tpu.memory_space<vmem>>, vector<8x128xf32>,
    %c0_43 = arith.constant 0 : index
    %c640 = arith.constant 640 : index
    %130 = vector.load %arg9[%c0_43, %c640] : memref<8x896xf32, #tpu.memory_space<vmem>>, vector<8x128xf32>
    tpu.vector_store %arg9[%c0_43, %c640], %113 {strides = array<i32>} : memref<8x896xf32, #tpu.memory_space<vmem>>, vector<8x128xf32>,
    %c0_44 = arith.constant 0 : index
    %c768 = arith.constant 768 : index
    %131 = vector.load %arg9[%c0_44, %c768] : memref<8x896xf32, #tpu.memory_space<vmem>>, vector<8x128xf32>
    tpu.vector_store %arg9[%c0_44, %c768], %120 {strides = array<i32>} : memref<8x896xf32, #tpu.memory_space<vmem>>, vector<8x128xf32>,
    return
  }
  func.func @transform_0(%arg0: i32) -> i32 {
    %c0_i32 = arith.constant 0 : i32
    %c0_i32_0 = arith.constant 0 : i32
    return %c0_i32 : i32
  }
  func.func @transform_1(%arg0: i32) -> (i32, i32) {
    %c0_i32 = arith.constant 0 : i32
    %c0_i32_0 = arith.constant 0 : i32
    return %arg0, %c0_i32 : i32, i32
  }
  func.func @transform_2(%arg0: i32) -> (i32, i32) {
    %c0_i32 = arith.constant 0 : i32
    %c0_i32_0 = arith.constant 0 : i32
    %c0_i32_1 = arith.constant 0 : i32
    return %c0_i32, %c0_i32_0 : i32, i32
  }
  func.func @transform_3(%arg0: i32) -> (i32, i32) {
    %c0_i32 = arith.constant 0 : i32
    %c0_i32_0 = arith.constant 0 : i32
    %c0_i32_1 = arith.constant 0 : i32
    return %c0_i32, %c0_i32_0 : i32, i32
  }
  func.func @transform_4(%arg0: i32) -> (i32, i32) {
    %c0_i32 = arith.constant 0 : i32
    %c0_i32_0 = arith.constant 0 : i32
    return %arg0, %c0_i32 : i32, i32
  }
  func.func @transform_5(%arg0: i32) -> (i32, i32) {
    %c0_i32 = arith.constant 0 : i32
    %c0_i32_0 = arith.constant 0 : i32
    %c0_i32_1 = arith.constant 0 : i32
    return %c0_i32, %c0_i32_0 : i32, i32
  }
  func.func @transform_6(%arg0: i32) -> (i32, i32) {
    %c0_i32 = arith.constant 0 : i32
    %c0_i32_0 = arith.constant 0 : i32
    %c0_i32_1 = arith.constant 0 : i32
    return %c0_i32, %c0_i32_0 : i32, i32
  }
  func.func @transform_7(%arg0: i32) -> (i32, i32) {
    %c0_i32 = arith.constant 0 : i32
    %c0_i32_0 = arith.constant 0 : i32
    %c0_i32_1 = arith.constant 0 : i32
    return %c0_i32, %c0_i32_0 : i32, i32
  }
  func.func @transform_8(%arg0: i32) -> (i32, i32) {
    %c0_i32 = arith.constant 0 : i32
    %c0_i32_0 = arith.constant 0 : i32
    return %arg0, %c0_i32 : i32, i32
  }
}

</mosaic_0001>

<bundles_post_ra>
// kernel: tpu_custom_call.1
= control target key start
LH: loop header
LB: loop body
LE: loop exit
PB: predicated region body
PF: predicated region fallthrough
CT: control target
= control target key end

     0   :  { %s3413_s0 = inlined_call_operand.vmem [shape: f32[4], index: 0, kind: input, shape index: {}]   ;;  %s3414_s1 = inlined_call_operand.vmem [shape: bf16[32,192], index: 1, kind: input, shape index: {}]   ;;  %s3415_s2 = inlined_call_operand.vmem [shape: bf16[192,32], index: 2, kind: input, shape index: {}]   ;;  %s3416_s3 = inlined_call_operand.vmem [shape: f32[1,32], index: 3, kind: input, shape index: {}]   ;;  %s3417_s4 = inlined_call_operand.hbm [shape: bf16[32,32], index: 4, kind: input, shape index: {}]   ;;  %s3418_s5 = inlined_call_operand.hbm [shape: bf16[8,32], index: 5, kind: input, shape index: {}]   ;;  %s3419_s6 = inlined_call_operand.vmem [shape: bf16[32,896], index: 6, kind: input, shape index: {}]   ;;  %s3420_s7 = inlined_call_operand.vmem [shape: f32[1,896], index: 7, kind: input, shape index: {}]   ;;  %s3421_s8 = inlined_call_operand.hbm [shape: f32[16,896], index: 8, kind: output, shape index: {}]  }
   0x1   :  { %3425 = sst [smem:[#allocation15_spill]] %s3413_s0 }
   0x2   :  { %13 = vsyncpa [#allocation5], 0 }
   0x3   :  { %14 = vsyncpa [#allocation3], 0 }
   0x4   :  { %16 = vsyncpa [#allocation3 + $0x1], 0 }
   0x5   :  { %17 = vsyncpa [#allocation8], 0 }
   0x6   :  { %18 = vsyncpa [#allocation4], 0 }
   0x7   :  { %20 = vsyncpa [#allocation4 + $0x1], 0  ;;  %s2586_s27 = smov 0   ;;  %s2588_s28 = smov 0  }
   0x8   :  { %s2590_s29 = smov 0   ;;  %s2592_s30 = smov 0  }
   0x9 LB: > { %s2607_s9 = sadd.s32 4294967295, %s2520_s30   ;;  %s2080_s10 = sadd.s32 4294967294, %s2520_s30   ;;  %s2520_s30 = sphi %s2592_s30, %s3455_s30   ;;  %s2516_s29 = sphi %s2590_s29, %s3454_s29   ;;  %s2512_s28 = sphi %s2588_s28, %s3453_s28   ;;  %s2508_s27 = sphi %s2586_s27, %s3452_s27  }
   0xa   : > { %s2611_s11 = sadd.s32 1, %s2520_s30   ;;  %s122_s12 = sadd.s32 1, %s2516_s29 }
   0xb   : > { %s119_s13 = ssub.s32 %s2520_s30, %s2611_s11  ;;  %p129_p0 = scmp.ne.s32.totalorder %s2516_s29, %s2512_s28 }
   0xc   : > { %p120_p1 = scmp.eq.s32.totalorder %s119_s13, 0  ;;  %p130_p2 = scmp.eq.s32.totalorder %s2520_s30, 0 }
   0xd   : > { %p135_p3 = scmp.ne.s32.totalorder %s2512_s28, %s2508_s27  ;;  %p3422_p4 = scmp.eq.s32.totalorder %s2607_s9, 0 }
   0xe   : > { %s2623_s14 = scalar_select %p120_p1, %s2516_s29, %s122_s12  }
   0xf   : > { %p2625_p5 = por %p130_p2, %p129_p0  ;;  %p2631_p6 = por %p3422_p4, %p135_p3 }
  0x10   : > { %3426 = sst [smem:[#allocation14_spill]] %s2623_s14  ;;  %p222_p7 = scmp.eq.s32.totalorder %s2607_s9, 1 }
  0x11   : > { %s3428_s16 = scalar_select %p2631_p6, 1, 0 }
  0x12   : > { %p228_p8 = scmp.eq.s32.totalorder %s2080_s10, 1  ;;  %p2081_p9 = scmp.ge.s32.totalorder %s2520_s30, 1 }
  0x13   : > { %p235_p10 = scmp.lt.s32.totalorder %s2520_s30, 3  ;;  %p2638_p11 = por %p222_p7, %p129_p0 }
  0x14   : > { %p2642_p12 = por %p228_p8, %p135_p3  ;;  %s3432_s0 = sld [smem:[#allocation15_spill]] }
  0x15   : > { %s3429_s17 = scalar_select %p2638_p11, 1, 0 }
  0x16   : > { %s3430_s18 = scalar_select %p2642_p12, 1, 0 }
  0x17   : > { %p2646_p13 = pnand %p2081_p9, %p235_p10  ;;  %p2209_p2 = scmp.lt.s32.totalorder %s2520_s30, 2 }
  0x18   : > { %s2522_s25 = smov [#allocation7]  }
  0x19   : > { %p2192_p1 = pneg %p2646_p13  ;;  %p2665_p3 = pnand %p2209_p2, %p2625_p5 }
  0x1a   : > { %s248_s22 = sshll.u32 %s3432_s0, 4  ;;  %s265_s26 = sshll.u32 %s2522_s25, 4  ;;  %s249_s22 = int_to_ptr.vmem [resolvable:$true] %s248_s22  ;;  %s2669_s26 = int_to_ptr.vmem [resolvable:$true] %s265_s26 }
  0x1b   : > { %p2659_p7 = pnand %p2192_p1, %p3422_p4  ;;  %s2373_s10 = scalar_lea.vmem %s249_s22, 16 }
  0x1c   : > { %p2374_p8 = scmp.ne.s32.totalorder %s249_s22, %s2373_s10  ;;  %p2381_p0 = scmp.lt.s32.totalorder %s249_s22, %s249_s22 }
  0x1d   : > { %p2375_p9 = pneg %p2659_p7  ;;  %p2382_p4 = scmp.lt.s32.totalorder %s2373_s10, %s2373_s10 }
  0x1f   : > { %p2376_p10 = pnand %p2375_p9, %p2374_p8  ;;  %p2383_p12 = por %p2382_p4, %p2381_p0 }
  0x21   : > { %p2377_p1 = pneg %p2376_p10 }
  0x23   : > { %p2384_p11 = pnand %p2383_p12, %p2377_p1 }
  0x25   : > { %2387 = shalt.err (!%p2384_p11)
}
  0x26   : > { %s2523_s12 = smov [#allocation2]   ;;  %s292_s13 = sand.u32 1, %s2516_s29  }
  0x27   : > { %2195 = dma.vmem_to_smem (!%p2659_p7), %s249_s22, 16, %s2523_s12, [#allocation5]  }
  0x28   : > { %s2388_s21 = scalar_lea.hbm %s3418_s5, 64 }
  0x29   : > { %p2389_p5 = scmp.ne.s32.totalorder %s3418_s5, %s2388_s21  ;;  %p2395_p11 = scmp.lt.u32.totalorder %s2388_s21, %s3418_s5 }
  0x2b   : > { %p2391_p4 = pnand %p2389_p5, %p2375_p9 }
  0x2d   : > { %p2392_p12 = pneg %p2391_p4 }
  0x2f   : > { %p2397_p0 = pnand %p2395_p11, %p2392_p12 }
  0x31   : > { %2400 = shalt.err (!%p2397_p0)
}
  0x32   : > { %s2401_s22 = scalar_lea.vmem %s2669_s26, 64  ;;  %p2409_p1 = scmp.lt.s32.totalorder %s2669_s26, %s2669_s26 }
  0x33   : > { %p2402_p2 = scmp.ne.s32.totalorder %s2669_s26, %s2401_s22  ;;  %p2410_p5 = scmp.lt.s32.totalorder %s2401_s22, %s2401_s22 }
  0x35   : > { %p2404_p8 = pnand %p2402_p2, %p2375_p9  ;;  %p2411_p4 = por %p2410_p5, %p2409_p1 }
  0x37   : > { %p2405_p10 = pneg %p2404_p8 }
  0x39   : > { %p2412_p6 = pnand %p2411_p4, %p2405_p10 }
  0x3b   : > { %2415 = shalt.err (!%p2412_p6)
}
  0x3c   : > { %2198 = dma.hbm_to_vmem [thread:$0]  (!%p2659_p7), %s3418_s5, 64, %s2669_s26, [#allocation8]  }
  0x3d   : > { %s2085_s12 = sshll.u32 %s292_s13, 3  ;;  %s2145_s15 = sshll.u32 %s2520_s30, 7 }
  0x3e   : > { %s2708_s25 = scalar_lea.hbm %s3417_s4, %s2145_s15  ;;  %s296_s23 = scalar_lea.vmem [#allocation6], %s2085_s12 }
  0x3f   : > { %s303_s10 = sshll.u32 %s296_s23, 4  ;;  %s2712_s22 = scalar_lea.sflag [#allocation3], %s292_s13  ;;  %s2710_s10 = int_to_ptr.vmem [resolvable:$true] %s303_s10 }
  0x40   : > { %s2416_s0 = scalar_lea.hbm %s2708_s25, 128  ;;  %p2418_p7 = pneg %p2665_p3 }
  0x41   : > { %p2417_p6 = scmp.ne.s32.totalorder %s2708_s25, %s2416_s0  ;;  %s2421_s15 = scalar_lea.hbm %s3417_s4, 256 }
  0x42   : > { %p2422_p11 = scmp.lt.u32.totalorder %s2708_s25, %s3417_s4  ;;  %p2423_p0 = scmp.lt.u32.totalorder %s2421_s15, %s2416_s0 }
  0x43   : > { %p2419_p9 = pnand %p2418_p7, %p2417_p6  ;;  %p2425_p8 = scmp.lt.u32.totalorder %s2416_s0, %s2708_s25 }
  0x44   : > { %p2424_p2 = por %p2423_p0, %p2422_p11 }
  0x45   : > { %p2420_p12 = pneg %p2419_p9 }
  0x46   : > { %p2426_p10 = por %p2425_p8, %p2424_p2 }
  0x48   : > { %p2427_p1 = pnand %p2426_p10, %p2420_p12 }
  0x4a   : > { %2430 = shalt.err (!%p2427_p1)
}
  0x4b   : > { %s2431_s13 = scalar_lea.vmem %s2710_s10, 128  ;;  %s2524_s12 = smov [#allocation6]  }
  0x4c   : > { %p2432_p5 = scmp.ne.s32.totalorder %s2710_s10, %s2431_s13  ;;  %s2436_s23 = sshll.u32 %s2524_s12, 4  ;;  %s2437_s23 = int_to_ptr.vmem [resolvable:$false] %s2436_s23 }
  0x4d   : > { %s2438_s26 = scalar_lea.vmem %s2437_s23, 256  ;;  %p2439_p9 = scmp.lt.s32.totalorder %s2710_s10, %s2437_s23 }
  0x4e   : > { %p2434_p4 = pnand %p2432_p5, %p2418_p7  ;;  %p2440_p11 = scmp.lt.s32.totalorder %s2438_s26, %s2431_s13 }
  0x50   : > { %p2435_p6 = pneg %p2434_p4  ;;  %p2441_p0 = por %p2440_p11, %p2439_p9 }
  0x52   : > { %p2442_p2 = pnand %p2441_p0, %p2435_p6 }
  0x54   : > { %2445 = shalt.err (!%p2442_p2)
}
  0x55   : > { %s2525_s0 = smov 64   ;;  %s2526_s14 = smov 4  }
  0x56   : > { %2202 = dma.hbm_to_vmem [thread:$0]  (!%p2665_p3), %s2708_s25, 128, %s2710_s10, %s2712_s22, %s2525_s0, %s2525_s0, %s2526_s14  }
  0x57   : > { %315 = sbr.rel (%p2646_p13) target bundleno = 2417 (0x971), region = 52  ;;  %p3435_p7 = scmp.eq.s32.totalorder (!%p2646_p13), %s2607_s9, 0 }
  0x5e   : > { %2491 = dma.done.wait (%p3435_p7), [#allocation5], 16   ;;  %p3436_p12 = pmov %p3435_p7 }
  0x5f   : > { %s2747_s15 = sand.u32 1, %s2512_s28   ;;  %p3437_p3 = scmp.ne.s32.totalorder %s3428_s16, 0 }
  0x60   : > { %2493 = vsyncadd (%p3436_p12), [#allocation5], 4294967280  ;;  %s2090_s20 = sshll.u32 %s2747_s15, 3  ;;  %s322_s21 = scalar_lea.sflag [#allocation3], %s2747_s15 }
  0x61   : > { %s2751_s13 = scalar_lea.vmem [#allocation6], %s2090_s20 }
  0x62   : > { %2495 = dma.done.wait (%p3437_p3), %s322_s21, 128  }
  0x63   : > { %2497 = vsyncadd (%p3437_p3), %s322_s21, 4294967168  ;;  %p3438_p13 = pmov %p3435_p7 }
  0x64   : > { %p3439_p8 = pmov %p3435_p7 }
  0x65   : > { %2499 = dma.done.wait (%p3438_p13), [#allocation8], 64  }
  0x66   : > { %2501 = vsyncadd (%p3439_p8), [#allocation8], 4294967232 }
  0x67   : > { %334 = sfence }
  0x68   : > { %v2262_v0 = vld [vmem:[%s3415_s2] sm:$0xff]   ;;  %v2527_v1 = vmov 0   ;;  %s2766_s25 = sshll.u32 %s2607_s9, 1  ;;  %v2263_v2 = vld [vmem:[%s3415_s2 + $0x8] sm:$0xff]   ;;  %v2264_v3 = vld [vmem:[%s3415_s2 + $0x10] sm:$0xff]   ;;  %vm492_vm0 = vcmask 523264  }
  0x69   : > { %496 = vmatprep.subr.bf16.mxu0 %v2527_v1  ;;  %p370_p10 = scmp.lt.s32.totalorder %s2766_s25, 3  ;;  %v2265_v4 = vld [vmem:[%s3415_s2 + $0x18] sm:$0xff]   ;;  %v2266_v5 = vld [vmem:[%s3415_s2 + $0x20] sm:$0xff]   ;;  %v2267_v7 = vld [vmem:[%s3415_s2 + $0x28] sm:$0xff]   ;;  %v2528_v15 = vmov 0.0   ;;  %vm2529_vm1 = vmmov 0  }
  0x6a   : > { %497 = vmatpush1.bf16.msra.mxu0 %v2262_v0  ;;  %v2268_v8 = vld [vmem:[%s3415_s2 + $0x30] sm:$0xff]   ;;  %v2269_v9 = vld [vmem:[%s3415_s2 + $0x38] sm:$0xff]   ;;  %v2270_v10 = vld [vmem:[%s3415_s2 + $0x40] sm:$0xff]   ;;  %2158 = vmatprep.subr.bf16.mxu1 %v2528_v15  ;;  %vm546_vm2 = vcmask 261120   ;;  %vm594_vm3 = vcmask 130048   ;;  %s2530_s20 = smov 64  }
  0x6b   : > { %498 = vmatprep.subr.bf16.mxu0 %v2527_v1  ;;  %s371_s22 = scalar_select %p370_p10, %s2766_s25, 3  ;;  %v2271_v11 = vld [vmem:[%s3415_s2 + $0x48] sm:$0xff]   ;;  %v2272_v12 = vld [vmem:[%s3415_s2 + $0x50] sm:$0xff]   ;;  %v2273_v13 = vld [vmem:[%s3415_s2 + $0x58] sm:$0xff]   ;;  %2160 = vmatprep.mubr.msk.bf16.mxu1 %vm2529_vm1, %v2528_v15  ;;  %vm1510_vm5 = vcmask 15360   ;;  %vm1631_vm6 = vcmask 1041409  }
  0x6c   : > { %v2095_v16 = vld [vmem:[%s3416_s3] ss:$0 sm:$0xff]  ;;  %v545_v31 = vld [vmem:[#allocation7] sm:$0xf]  ;;  %v2282_v49 = vld [vmem:[%s3419_s6 + $0x3c] ss:$28 sps:$4 sm:$0xff]  }
  0x6d   : > { %s2146_s26 = sshll.u32 %s371_s22, 3  ;;  %v2148_v17 = vld [vmem:[%s2751_s13] sm:$0xff]   ;;  %v2280_v50 = vld [vmem:[%s3419_s6 + $0x38] ss:$28 sps:$4 sm:$0xff]   ;;  %s1713_s21 = sadd.s32 1, %s2766_s25  ;;  %vm1633_vm7 = vcmask 1042434  }
  0x6e   : > { %499 = vmatpush1.bf16.msra.mxu0 %v2263_v2  ;;  %s374_s19 = scalar_lea.vmem %s3414_s1, %s2146_s26  ;;  %v2149_v20 = vunpack.c.l.bf16 %v2148_v17  ;;  %v2150_v22 = vunpack.c.h.bf16 %v2148_v17  ;;  %v2279_v43 = vld [vmem:[%s3419_s6 + $0x4] ss:$28 sps:$4 sm:$0xff]   ;;  %v2285_v51 = vld [vmem:[%s3419_s6 + $0xc] ss:$28 sps:$4 sm:$0xff]   ;;  %v2291_v60 = vld [vmem:[%s3419_s6 + $0x14] ss:$28 sps:$4 sm:$0xff]  }
  0x6f   : > { %500 = vmatprep.subr.bf16.mxu0 %v2527_v1  ;;  %v2276_v6 = vld [vmem:[%s374_s19 + $0x4] ss:$8 sps:$4 sm:$0xff]   ;;  %v2274_v14 = vld [vmem:[%s374_s19] ss:$8 sps:$4 sm:$0xff]   ;;  %v2295_v0 = vld [vmem:[%s3419_s6 + $0x18] ss:$28 sps:$4 sm:$0xff]  }
  0x70   : > { %2110 = vmatprep.mubr.msk.bf16.mxu0 %vm492_vm0, %v2276_v6  ;;  %v2277_v47 = vld [vmem:[%s3419_s6] ss:$28 sps:$4 sm:$0xff]   ;;  %v2283_v53 = vld [vmem:[%s3419_s6 + $0x8] ss:$28 sps:$4 sm:$0xff]   ;;  %v2289_v61 = vld [vmem:[%s3419_s6 + $0x10] ss:$28 sps:$4 sm:$0xff]  }
  0x71   : > { %v2288_v56 = vld [vmem:[%s3419_s6 + $0x44] ss:$28 sps:$4 sm:$0xff]   ;;  %v2294_v62 = vld [vmem:[%s3419_s6 + $0x4c] ss:$28 sps:$4 sm:$0xff]   ;;  %s1712_s24 = sld [smem:[#allocation2 + %s2766_s25]]  ;;  %s2178_s10 = smul.u32 56, %s2747_s15 }
  0x72   : > { %501 = vmatpush1.bf16.msra.mxu0 %v2264_v3  ;;  %v2286_v59 = vld [vmem:[%s3419_s6 + $0x40] ss:$28 sps:$4 sm:$0xff]   ;;  %v2292_v63 = vld [vmem:[%s3419_s6 + $0x48] ss:$28 sps:$4 sm:$0xff]   ;;  %v2296_v2 = vld [vmem:[%s3419_s6 + $0x50] ss:$28 sps:$4 sm:$0xff]  }
  0x73   : > { %502 = vmatprep.subr.bf16.mxu0 %v2527_v1  ;;  %s1714_s16 = sld [smem:[#allocation2 + %s1713_s21]]  ;;  %s2937_s22 = scalar_lea.vmem [#allocation9], %s2178_s10  ;;  %vm1635_vm8 = vcmask 1043459   ;;  %vm1637_vm9 = vcmask 1044484   ;;  %vm1639_vm10 = vcmask 1045509   ;;  %vm1641_vm11 = vcmask 1046534  }
  0x74   : > { %s2533_s25 = smov 126   ;;  %s2534_s12 = smov 120   ;;  %vm1643_vm12 = vcmask 1047559  }
  0x75   : > { %s2535_s23 = smov 116   ;;  %s2536_s26 = smov 124  }
  0x76   : > { %503 = vmatpush1.bf16.msra.mxu0 %v2265_v4  ;;  %s2537_s13 = smov 122   ;;  %s2538_s19 = smov 118  }
  0x77   : > { %504 = vmatprep.subr.bf16.mxu0 %v2527_v1  ;;  %s2539_s0 = smov 114   ;;  %s2179_s14 = smul.u32 896, %s2607_s9 }
  0x78   : > { %s1962_s9 = scalar_lea.sflag [#allocation4], %s2747_s15  ;;  %p3448_p5 = scmp.ne.s32.totalorder %s3429_s17, 0 }
  0x7a   : > { %505 = vmatpush1.bf16.msra.mxu0 %v2266_v5  ;;  %v2892_v5 = vld [vmem:[%s3420_s7] sm:$0xff] }
  0x7b   : > { %506 = vmatprep.subr.bf16.mxu0 %v2527_v1 }
  0x7e   : > { %507 = vmatpush1.bf16.msra.mxu0 %v2267_v7 }
  0x7f   : > { %508 = vmatprep.subr.bf16.mxu0 %v2527_v1 }
  0x82   : > { %509 = vmatpush1.bf16.msra.mxu0 %v2268_v8 }
  0x83   : > { %510 = vmatprep.subr.bf16.mxu0 %v2527_v1 }
  0x86   : > { %511 = vmatpush1.bf16.msra.mxu0 %v2269_v9 }
  0x87   : > { %512 = vmatprep.subr.bf16.mxu0 %v2527_v1 }
  0x8a   : > { %513 = vmatpush1.bf16.msra.mxu0 %v2270_v10 }
  0x8b   : > { %514 = vmatprep.subr.bf16.mxu0 %v2527_v1 }
  0x8e   : > { %515 = vmatpush1.bf16.msra.mxu0 %v2271_v11 }
  0x8f   : > { %516 = vmatprep.subr.bf16.mxu0 %v2527_v1 }
  0x92   : > { %517 = vmatpush1.bf16.msra.mxu0 %v2272_v12 }
  0x93   : > { %518 = vmatprep.subr.bf16.mxu0 %v2527_v1 }
  0x96   : > { %519 = vmatpush1.bf16.msra.mxu0 %v2273_v13 }
  0x99   : > { %529 = vmatmul.mubr.bf16.vlgmr.msra.gmra.mrb[0].mxu0 %v2274_v14 }
 0x16c   : > { %v530_v18 = vpop.f32.mrb[0].mxu0 }
 0x16d   : > { %v531_v19 = vadd.f32 %v2095_v16, %v530_v18  ;;  %v532_v21 = vpop.f32.mrb[1].mxu0 }
 0x16e   : > { %v533_v23 = vpop.f32.mrb[2].mxu0 }
 0x16f   : > { %v534_v24 = vadd.f32 %v2095_v16, %v533_v23  ;;  %v535_v25 = vpop.f32.mrb[3].mxu0  ;;  %v541_v26 = vadd.f32 %v2149_v20, %v531_v19 }
 0x171   : > { %v542_v27 = vadd.f32 %v2150_v22, %v534_v24  ;;  %v544_v28 = vpack.c.bf16 %v534_v24, %v531_v19 }
 0x173   : > { %v543_v29 = vpack.c.bf16 %v542_v27, %v541_v26 }
 0x175   : > { %v551_v30 = vsel %vm546_vm2, %v543_v29, 0 }
 0x176   : > { %2159 = vmatpush3.bf16.xpose.msra.mxu1 %v551_v30 }
 0x177   : > { %2164 = vmatprep.subr.bf16.mxu1 %v2528_v15 }
 0x17d   : > { %2161 = vmatmul.mubr.msk.bf16.vlgmr.msra.gmra.mrb[0].mxu1 %vm546_vm2, %v545_v31 }
 0x17e   : > { %2165 = vmatpush3.bf16.msra.mxu1 %v544_v28  ;;  %2166 = vmatprep.mubr.msk.bf16.mxu1 %vm2529_vm1, %v2528_v15 }
 0x17f   : > { %779 = vmatprep.subr.bf16.mxu1 %v2279_v43 }
 0x250   : > { %v587_v32 = vpop.f32.mrb[0].mxu1 }
 0x251   : > { %v593_v33 = vmul.f32 0.17677669, %v587_v32  ;;  %v2162_v34 = vpop.f32.mrb[1].mxu1 }
 0x252   : > { %v590_v35 = vpop.f32.mrb[2].mxu1 }
 0x253   : > { %v2163_v36 = vpop.f32.mrb[3].mxu1  ;;  %v595_v37 = vsel %vm594_vm3, %v593_v33, -inf }
 0x254   : > { %596 = vmax.xlane.f32.xlu0 %v595_v37 }
 0x2e1   : > { %v597_v38 = vpop.xlane.xlu0 %596 }
 0x2e2   : > { %v598_v39 = vsub.f32 %v593_v33, %v597_v38 }
 0x2e4   : > { %v599_v40 = vmul.f32 1.442695, %v598_v39 }
 0x2e6   : > { %2297 = vpow2.f32 %v599_v40 }
 0x2f0   : > { %v2298_v41 = vpop.eup %2297 }
 0x2f1   : > { %v601_v42 = vsel %vm594_vm3, %v2298_v41, 0.0 }
 0x2f2   : > { %602 = vadd.xlane.f32.xlu0 %v601_v42 }
 0x37f   : > { %v603_v44 = vpop.xlane.xlu0 %602 }
 0x380   : > { %2299 = vrcp.f32 %v603_v44 }
 0x38a   : > { %v2300_v45 = vpop.eup %2299 }
 0x38b   : > { %v605_v46 = vmul.f32 %v2300_v45, %v2298_v41 }
 0x38d   : > { %v606_v48 = vpack.c.bf16 %v605_v46, %v605_v46 }
 0x38f   : > { %2167 = vmatmul.mubr.msk.bf16.vlgmr.msra.gmra.mrb[4].mxu1 %vm594_vm3, %v606_v48 }
 0x390   : > { %780 = vmatpush1.bf16.msra.mxu1 %v2277_v47  ;;  %811 = vmatprep.mubr.bf16.mxu1 %v2527_v1 }
 0x391   : > { %781 = vmatprep.subr.bf16.mxu1 %v2282_v49 }
 0x394   : > { %782 = vmatpush1.bf16.msra.mxu1 %v2280_v50  ;;  %v1728_v50 = vstv %s1712_s24 }
 0x395   : > { %820 = vmatprep.subr.bf16.mxu1 %v2285_v51  ;;  %v1729_v51 = vstv %s1714_s16  ;;  %s3368_s16 = scalar_lea.hbm %s3421_s8, %s2179_s14 }
 0x462   : > { %v644_v52 = vpop.f32.mrb[4].mxu1 }
 0x463   : > { %v650_v54 = vpack.c.bf16 %v644_v52, %v644_v52  ;;  %v2168_v55 = vpop.f32.mrb[5].mxu1 }
 0x464   : > { %v647_v57 = vpop.f32.mrb[6].mxu1 }
 0x465   : > { %v2169_v58 = vpop.f32.mrb[7].mxu1  ;;  %2127 = vmatmul.mubr.msk.bf16.vlgmr.msra.gmra.mrb[8].mxu1 %vm546_vm2, %v650_v54 }
 0x466   : > { %821 = vmatpush1.bf16.msra.mxu1 %v2283_v53  ;;  %852 = vmatprep.mubr.bf16.mxu1 %v2527_v1  ;;  %v2531_v58 = vmov 1983009808  }
 0x467   : > { %822 = vmatprep.subr.bf16.mxu1 %v2288_v56 }
 0x46a   : > { %823 = vmatpush1.bf16.msra.mxu1 %v2286_v59  ;;  %v961_v59 = vunpack.c.l.s4 %v2531_v58 }
 0x46b   : > { %861 = vmatprep.subr.bf16.mxu1 %v2291_v60 }
 0x46d   : > { %2128 = vmatmul.mubr.msk.bf16.vlgmr.msra.gmra.mrb[12].mxu1 %vm546_vm2, %v650_v54 }
 0x46e   : > { %862 = vmatpush1.bf16.msra.mxu1 %v2289_v61  ;;  %893 = vmatprep.mubr.bf16.mxu1 %v2527_v1  ;;  %v669_v1 = vlaneseq  ;;  %v962_v61 = vunpack.c.0.s8 %v961_v59 }
 0x46f   : > { %863 = vmatprep.subr.bf16.mxu1 %v2294_v62  ;;  %v2532_v62 = vmov 1934713408  }
 0x470   : > { %v2886_v3 = vshrl.u32 %v669_v1, 7  ;;  %v2932_v46 = vand.u32 127, %v669_v1 }
 0x472   : > { %864 = vmatpush1.bf16.msra.mxu1 %v2292_v63  ;;  %v671_v4 = vsub.s32 0, %v2886_v3  ;;  %v675_v6 = vsub.s32 1, %v2886_v3  ;;  %v679_v12 = vsub.s32 2, %v2886_v3  ;;  %v691_v26 = vsub.s32 5, %v2886_v3 }
 0x473   : > { %2170 = vmatprep.subr.bf16.mxu1 %v2528_v15  ;;  %v695_v33 = vsub.s32 6, %v2886_v3  ;;  %v1719_v48 = vand.u32 1, %v2932_v46  ;;  %v1025_v63 = vunpack.c.l.s4 %v2532_v62 }
 0x474   : > { %v672_v7 = vrot.slane %v2892_v5, %v671_v4  ;;  %v676_v8 = vrot.slane %v2892_v5, %v675_v6  ;;  %v680_v19 = vrot.slane %v2892_v5, %v679_v12  ;;  %v692_v30 = vrot.slane %v2892_v5, %v691_v26 }
 0x475   : > { %2129 = vmatmul.mubr.msk.bf16.vlgmr.msra.gmra.mrb[16].mxu1 %vm546_vm2, %v650_v54  ;;  %v696_v38 = vrot.slane %v2892_v5, %v695_v33  ;;  %vm1727_vm4 = vcmp.eq.s32.totalorder %v1719_v48, 0  ;;  %v1026_v6 = vunpack.c.0.s8 %v1025_v63 }
 0x476   : > { %2171 = vmatpush3.bf16.msra.mxu1 %v2295_v0  ;;  %2174 = vmatprep.mubr.msk.bf16.mxu1 %vm2529_vm1, %v2528_v15  ;;  %v1730_v53 = vsel %vm1727_vm4, %v1728_v50, %v1729_v51 }
 0x477   : > { %2172 = vmatprep.subr.bf16.mxu1 %v2528_v15  ;;  %v683_v15 = vsub.s32 3, %v2886_v3 }
 0x479   : > { %v684_v20 = vrot.slane %v2892_v5, %v683_v15 }
 0x47a   : > { %2173 = vmatpush3.bf16.msra.mxu1 %v2296_v2  ;;  %v2942_v2 = vsub.s32 %v962_v61, %v2886_v3 }
 0x47d   : > { %2175 = vmatmul.mubr.msk.bf16.vlgmr.msra.gmra.mrb[20].mxu1 %vm546_vm2, %v650_v54 }
 0x538   : > { %v813_v9 = vpop.f32.mrb[8].mxu1 }
 0x539   : > { %v2897_v10 = vadd.f32 %v813_v9, %v672_v7  ;;  %v815_v11 = vpop.f32.mrb[9].mxu1 }
 0x53a   : > { %v2900_v13 = vadd.f32 %v815_v11, %v676_v8  ;;  %v817_v14 = vpop.f32.mrb[10].mxu1 }
 0x53b   : > { %v818_v16 = vpop.f32.mrb[11].mxu1  ;;  %943 = vrot.lane.b32.xlu1 %v2897_v10, %s2530_s20 }
 0x53c   : > { %v958_v17 = vcombine.low %v2897_v10, %v2900_v13  ;;  %v959_v18 = vcombine.high %v2897_v10, %v2900_v13 }
 0x53e   : > { %v966_v11 = vrot.slane %v958_v17, %v2942_v2  ;;  %v973_v12 = vrot.slane %v959_v18, %v2942_v2 }
 0x53f   : > { %947 = vrot.lane.b32.xlu1 %v2900_v13, %s2530_s20 }
 0x540   : > { %v854_v21 = vpop.f32.mrb[12].mxu1 }
 0x541   : > { %v2913_v22 = vadd.f32 %v854_v21, %v680_v19  ;;  %v856_v23 = vpop.f32.mrb[13].mxu1  ;;  %v2955_v19 = vsub.s32 %v1026_v6, %v2886_v3 }
 0x542   : > { %v2915_v24 = vadd.f32 %v856_v23, %v684_v20  ;;  %v858_v25 = vpop.f32.mrb[14].mxu1 }
 0x543   : > { %v859_v27 = vpop.f32.mrb[15].mxu1  ;;  %951 = vrot.lane.b32.xlu0 %v2913_v22, %s2530_s20 }
 0x544   : > { %v990_v28 = vcombine.low %v2913_v22, %v2915_v24  ;;  %v991_v29 = vcombine.high %v2913_v22, %v2915_v24  ;;  %955 = vrot.lane.b32.xlu1 %v2915_v24, %s2530_s20 }
 0x546   : > { %v998_v25 = vrot.slane %v990_v28, %v2942_v2  ;;  %v1005_v10 = vrot.slane %v991_v29, %v2942_v2 }
 0x548   : > { %v2927_v31 = vpop.f32.mrb[16].mxu1 }
 0x549   : > { %v897_v32 = vpop.f32.mrb[17].mxu1 }
 0x54a   : > { %v898_v34 = vadd.f32 %v897_v32, %v692_v30  ;;  %v899_v35 = vpop.f32.mrb[18].mxu1 }
 0x54b   : > { %v900_v36 = vpop.f32.mrb[19].mxu1 }
 0x54c   : > { %v2140_v37 = vmul.f32 -1.442695, %v898_v34 }
 0x54e   : > { %2301 = vpow2.f32 %v2140_v37 }
 0x550   : > { %v936_v39 = vpop.f32.mrb[20].mxu1 }
 0x551   : > { %v937_v40 = vadd.f32 %v936_v39, %v696_v38  ;;  %v2176_v41 = vpop.f32.mrb[21].mxu1 }
 0x552   : > { %v939_v42 = vpop.f32.mrb[22].mxu1 }
 0x553   : > { %v2141_v43 = vmul.f32 -1.442695, %v937_v40  ;;  %v2177_v44 = vpop.f32.mrb[23].mxu1 }
 0x555   : > { %2303 = vpow2.f32 %v2141_v43 }
 0x558   : > { %v2302_v45 = vpop.eup %2301 }
 0x559   : > { %v1734_v47 = vadd.f32 1.0, %v2302_v45 }
 0x55b   : > { %2305 = vrcp.f32 %v1734_v47 }
 0x55f   : > { %v2304_v49 = vpop.eup %2303 }
 0x560   : > { %v1741_v52 = vadd.f32 1.0, %v2304_v49 }
 0x562   : > { %2307 = vrcp.f32 %v1741_v52 }
 0x565   : > { %v2306_v54 = vpop.eup %2305 }
 0x566   : > { %v1737_v55 = vmul.f32 %v2306_v54, %v1730_v53 }
 0x568   : > { %1959 = vst [vmem:[%s2937_s22 + $0x28] sm:$0xff] %v1737_v55 }
 0x56c   : > { %v2308_v56 = vpop.eup %2307 }
 0x56d   : > { %v1744_v57 = vmul.f32 %v2308_v56, %v1730_v53  ;;  %v687_v53 = vsub.s32 4, %v2886_v3 }
 0x56f   : > { %1960 = vst [vmem:[%s2937_s22 + $0x30] sm:$0xff] %v1744_v57  ;;  %v688_v55 = vrot.slane %v2892_v5, %v687_v53 }
 0x571   : > { %v2992_v56 = vadd.f32 %v2927_v31, %v688_v55 }
 0x5ad   : > { %v944_v60 = vpop.permute.xlu1 %943 }
 0x5b1   : > { %v948_v0 = vpop.permute.xlu1 %947 }
 0x5b2   : > { %v974_v1 = vcombine.low %v944_v60, %v948_v0  ;;  %v975_v4 = vcombine.high %v944_v60, %v948_v0 }
 0x5b4   : > { %v982_v7 = vrot.slane %v974_v1, %v2942_v2  ;;  %v989_v8 = vrot.slane %v975_v4, %v2942_v2 }
 0x5b5   : > { %v952_v9 = vpop.permute.xlu0 %951 }
 0x5b6   : > { %v956_v14 = vpop.permute.xlu1 %955  ;;  %v1022_v20 = vcombine.low %v966_v11, %v982_v7  ;;  %v1023_v21 = vcombine.high %v966_v11, %v982_v7  ;;  %v1039_v23 = vcombine.high %v973_v12, %v989_v8  ;;  %v1038_v18 = vcombine.low %v973_v12, %v989_v8 }
 0x5b7   : > { %v1006_v15 = vcombine.low %v952_v9, %v956_v14  ;;  %v1007_v16 = vcombine.high %v952_v9, %v956_v14 }
 0x5b8   : > { %v1030_v33 = vrot.slane %v1022_v20, %v2955_v19  ;;  %v1053_v34 = vrot.slane %v1039_v23, %v2955_v19  ;;  %v1037_v28 = vrot.slane %v1023_v21, %v2955_v19  ;;  %v1046_v36 = vrot.slane %v1038_v18, %v2955_v19 }
 0x5b9   : > { %v1014_v13 = vrot.slane %v1006_v15, %v2942_v2  ;;  %v1021_v17 = vrot.slane %v1007_v16, %v2942_v2 }
 0x5bb   : > { %v1054_v26 = vcombine.low %v998_v25, %v1014_v13  ;;  %v1055_v27 = vcombine.high %v998_v25, %v1014_v13  ;;  %v1070_v30 = vcombine.low %v1005_v10, %v1021_v17  ;;  %v1071_v32 = vcombine.high %v1005_v10, %v1021_v17 }
 0x5bd   : > { %v1062_v35 = vrot.slane %v1054_v26, %v2955_v19  ;;  %v1085_v22 = vrot.slane %v1071_v32, %v2955_v19  ;;  %v1069_v24 = vrot.slane %v1055_v27, %v2955_v19  ;;  %v1078_v29 = vrot.slane %v1070_v30, %v2955_v19 }
 0x5bf   : > { %v1087_v37 = vcombine.high %v1030_v33, %v1062_v35  ;;  %v1086_v38 = vcombine.low %v1030_v33, %v1062_v35  ;;  %v1092_v39 = vcombine.low %v1053_v34, %v1085_v22  ;;  %v1088_v40 = vcombine.low %v1037_v28, %v1069_v24 }
 0x5c0   : > { %v1089_v41 = vcombine.high %v1037_v28, %v1069_v24  ;;  %v1090_v42 = vcombine.low %v1046_v36, %v1078_v29  ;;  %v2975_v43 = vcombine.high %v1046_v36, %v1078_v29  ;;  %v2977_v44 = vcombine.high %v1053_v34, %v1085_v22 }
 0x5c1   : > { %v1097_v45 = vsel %vm492_vm0, %v1087_v37, -inf  ;;  %v1094_v47 = vsel %vm492_vm0, %v1086_v38, -inf  ;;  %v1112_v48 = vsel %vm492_vm0, %v1092_v39, -inf  ;;  %v1100_v49 = vsel %vm492_vm0, %v1088_v40, -inf }
 0x5c2   : > { %1098 = vmax.xlane.f32.xlu0 %v1097_v45  ;;  %1095 = vmax.xlane.f32.xlu1 %v1094_v47  ;;  %v1103_v50 = vsel %vm492_vm0, %v1089_v41, -inf  ;;  %v1106_v51 = vsel %vm492_vm0, %v1090_v42, -inf  ;;  %v1109_v52 = vsel %vm492_vm0, %v2975_v43, -inf  ;;  %v1115_v54 = vsel %vm492_vm0, %v2977_v44, -inf }
 0x5c6   : > { %1113 = vmax.xlane.f32.xlu0 %v1112_v48  ;;  %1101 = vmax.xlane.f32.xlu1 %v1100_v49 }
 0x5ca   : > { %1104 = vmax.xlane.f32.xlu1 %v1103_v50 }
 0x5ce   : > { %1107 = vmax.xlane.f32.xlu1 %v1106_v51 }
 0x5d2   : > { %1110 = vmax.xlane.f32.xlu1 %v1109_v52 }
 0x5d6   : > { %1116 = vmax.xlane.f32.xlu1 %v1115_v54 }
 0x5dc   : > { %1353 = vrot.lane.b32.xlu0 %v2992_v56, %s2533_s25  ;;  %s2540_s25 = smov [#allocation9]  }
 0x5e0   : > { %1362 = vrot.lane.b32.xlu0 %v2992_v56, %s2534_s12  ;;  %s2450_s12 = sshll.u32 %s2540_s25, 4  ;;  %s2451_s12 = int_to_ptr.vmem [resolvable:$false] %s2450_s12 }
 0x5e4   : > { %1368 = vrot.lane.b32.xlu0 %v2992_v56, %s2535_s23  ;;  %s2452_s23 = scalar_lea.vmem %s2451_s12, 1792 }
 0x5e7   : > { %1356 = vrot.lane.b32.xlu1 %v2992_v56, %s2536_s26 }
 0x5eb   : > { %1359 = vrot.lane.b32.xlu1 %v2992_v56, %s2537_s13 }
 0x5ef   : > { %1365 = vrot.lane.b32.xlu1 %v2992_v56, %s2538_s19 }
 0x5f3   : > { %1371 = vrot.lane.b32.xlu1 %v2992_v56, %s2539_s0 }
 0x64f   : > { %v1099_v5 = vpop.xlane.xlu0 %1098  ;;  %v1096_v31 = vpop.xlane.xlu1 %1095 }
 0x650   : > { %v1119_v57 = vsub.f32 %v1087_v37, %v1099_v5  ;;  %v1118_v58 = vsub.f32 %v1086_v38, %v1096_v31 }
 0x652   : > { %v1128_v59 = vmul.f32 1.442695, %v1119_v57  ;;  %v1126_v60 = vmul.f32 1.442695, %v1118_v58 }
 0x653   : > { %v1102_v61 = vpop.xlane.xlu1 %1101  ;;  %v1114_v0 = vpop.xlane.xlu0 %1113 }
 0x654   : > { %2309 = vpow2.f32 %v1128_v59  ;;  %v1120_v62 = vsub.f32 %v1088_v40, %v1102_v61  ;;  %v1124_v6 = vsub.f32 %v1092_v39, %v1114_v0 }
 0x655   : > { %2311 = vpow2.f32 %v1126_v60 }
 0x656   : > { %v1130_v63 = vmul.f32 1.442695, %v1120_v62  ;;  %v1138_v12 = vmul.f32 1.442695, %v1124_v6 }
 0x657   : > { %v1105_v1 = vpop.xlane.xlu1 %1104  ;;  %v1354_v13 = vpop.permute.xlu0 %1353 }
 0x658   : > { %v1121_v4 = vsub.f32 %v1089_v41, %v1105_v1  ;;  %2313 = vpow2.f32 %v1130_v63 }
 0x65a   : > { %v1132_v7 = vmul.f32 1.442695, %v1121_v4 }
 0x65b   : > { %v1108_v8 = vpop.xlane.xlu1 %1107  ;;  %v1363_v34 = vpop.permute.xlu0 %1362 }
 0x65c   : > { %2315 = vpow2.f32 %v1132_v7  ;;  %v1122_v9 = vsub.f32 %v1090_v42, %v1108_v8 }
 0x65e   : > { %v3001_v11 = vpop.eup %2309  ;;  %v1134_v14 = vmul.f32 1.442695, %v1122_v9 }
 0x65f   : > { %v3003_v15 = vpop.eup %2311  ;;  %v1111_v16 = vpop.xlane.xlu1 %1110  ;;  %v1145_v20 = vsel %vm492_vm0, %v3001_v11, 0.0 }
 0x660   : > { %2317 = vpow2.f32 %v1134_v14  ;;  %v1123_v21 = vsub.f32 %v2975_v43, %v1111_v16  ;;  %1146 = vadd.xlane.f32.xlu1 %v1145_v20  ;;  %v1142_v23 = vsel %vm492_vm0, %v3003_v15, 0.0  ;;  %v1369_v37 = vpop.permute.xlu0 %1368 }
 0x661   : > { %2319 = vpow2.f32 %v1138_v12  ;;  %1143 = vadd.xlane.f32.xlu0 %v1142_v23  ;;  %v1406_v47 = vcombine.low %v1363_v34, %v1369_v37  ;;  %v1407_v48 = vcombine.high %v1363_v34, %v1369_v37 }
 0x662   : > { %v1136_v25 = vmul.f32 1.442695, %v1123_v21  ;;  %v3010_v10 = vpop.eup %2313 }
 0x663   : > { %v1117_v17 = vpop.xlane.xlu1 %1116  ;;  %v1148_v26 = vsel %vm492_vm0, %v3010_v10, 0.0  ;;  %v1414_v31 = vrot.slane %v1406_v47, %v2942_v2  ;;  %v1421_v57 = vrot.slane %v1407_v48, %v2942_v2 }
 0x664   : > { %2321 = vpow2.f32 %v1136_v25  ;;  %v1125_v18 = vsub.f32 %v2977_v44, %v1117_v17 }
 0x665   : > { %1149 = vadd.xlane.f32.xlu0 %v1148_v26 }
 0x666   : > { %v3015_v27 = vpop.eup %2315  ;;  %v1140_v30 = vmul.f32 1.442695, %v1125_v18 }
 0x667   : > { %v1357_v32 = vpop.permute.xlu1 %1356  ;;  %v1151_v33 = vsel %vm492_vm0, %v3015_v27, 0.0 }
 0x668   : > { %2323 = vpow2.f32 %v1140_v30  ;;  %v1374_v38 = vcombine.low %v2992_v56, %v1357_v32  ;;  %v1375_v43 = vcombine.high %v2992_v56, %v1357_v32 }
 0x669   : > { %1152 = vadd.xlane.f32.xlu0 %v1151_v33 }
 0x66a   : > { %v3019_v28 = vpop.eup %2317  ;;  %v1382_v49 = vrot.slane %v1374_v38, %v2942_v2  ;;  %v1389_v55 = vrot.slane %v1375_v43, %v2942_v2 }
 0x66b   : > { %v1360_v35 = vpop.permute.xlu1 %1359  ;;  %v1154_v22 = vsel %vm492_vm0, %v3019_v28, 0.0  ;;  %v3023_v24 = vpop.eup %2319 }
 0x66c   : > { %1155 = vadd.xlane.f32.xlu1 %v1154_v22  ;;  %v1390_v29 = vcombine.low %v1354_v13, %v1360_v35  ;;  %v1391_v39 = vcombine.high %v1354_v13, %v1360_v35  ;;  %v1160_v41 = vsel %vm492_vm0, %v3023_v24, 0.0 }
 0x66e   : > { %v3025_v36 = vpop.eup %2321  ;;  %v1398_v44 = vrot.slane %v1390_v29, %v2942_v2  ;;  %v1405_v50 = vrot.slane %v1391_v39, %v2942_v2 }
 0x66f   : > { %v1366_v40 = vpop.permute.xlu1 %1365  ;;  %v1157_v42 = vsel %vm492_vm0, %v3025_v36, 0.0 }
 0x670   : > { %1161 = vadd.xlane.f32.xlu1 %v1160_v41  ;;  %1158 = vadd.xlane.f32.xlu0 %v1157_v42  ;;  %v1438_v56 = vcombine.low %v1382_v49, %v1398_v44  ;;  %v1439_v5 = vcombine.high %v1382_v49, %v1398_v44  ;;  %v1454_v60 = vcombine.low %v1389_v55, %v1405_v50 }
 0x671   : > { %v1455_v61 = vcombine.high %v1389_v55, %v1405_v50 }
 0x672   : > { %v3034_v45 = vpop.eup %2323  ;;  %v1446_v4 = vrot.slane %v1438_v56, %v2955_v19  ;;  %v1453_v6 = vrot.slane %v1439_v5, %v2955_v19  ;;  %v1462_v14 = vrot.slane %v1454_v60, %v2955_v19 }
 0x673   : > { %v1372_v51 = vpop.permute.xlu1 %1371  ;;  %v1163_v52 = vsel %vm492_vm0, %v3034_v45, 0.0  ;;  %v1469_v16 = vrot.slane %v1455_v61, %v2955_v19 }
 0x674   : > { %v1422_v53 = vcombine.low %v1366_v40, %v1372_v51  ;;  %v1423_v54 = vcombine.high %v1366_v40, %v1372_v51  ;;  %1164 = vadd.xlane.f32.xlu0 %v1163_v52 }
 0x676   : > { %v1430_v58 = vrot.slane %v1422_v53, %v2942_v2  ;;  %v1437_v59 = vrot.slane %v1423_v54, %v2942_v2 }
 0x678   : > { %v1470_v62 = vcombine.low %v1414_v31, %v1430_v58  ;;  %v1471_v63 = vcombine.high %v1414_v31, %v1430_v58  ;;  %v1486_v0 = vcombine.low %v1421_v57, %v1437_v59  ;;  %v1487_v1 = vcombine.high %v1421_v57, %v1437_v59 }
 0x67a   : > { %v1478_v7 = vrot.slane %v1470_v62, %v2955_v19  ;;  %v1485_v8 = vrot.slane %v1471_v63, %v2955_v19  ;;  %v1494_v9 = vrot.slane %v1486_v0, %v2955_v19  ;;  %v1501_v12 = vrot.slane %v1487_v1, %v2955_v19 }
 0x67c   : > { %v1502_v20 = vcombine.low %v1446_v4, %v1478_v7  ;;  %v1503_v21 = vcombine.high %v1446_v4, %v1478_v7  ;;  %v1504_v23 = vcombine.low %v1453_v6, %v1485_v8  ;;  %v1505_v25 = vcombine.high %v1453_v6, %v1485_v8 }
 0x67d   : > { %v1506_v13 = vcombine.low %v1462_v14, %v1494_v9  ;;  %v1507_v17 = vcombine.high %v1462_v14, %v1494_v9  ;;  %v1508_v18 = vcombine.low %v1469_v16, %v1501_v12  ;;  %v1509_v26 = vcombine.high %v1469_v16, %v1501_v12 }
 0x67e   : > { %v1511_v30 = vsel %vm1510_vm5, %v1502_v20, 0.0  ;;  %v1518_v32 = vsel %vm1510_vm5, %v1503_v21, 0.0  ;;  %v1525_v33 = vsel %vm1510_vm5, %v1504_v23, 0.0  ;;  %v1532_v34 = vsel %vm1510_vm5, %v1505_v25, 0.0 }
 0x67f   : > { %v1512_v35 = vrot.slane %v1511_v30, 4  ;;  %v1519_v22 = vrot.slane %v1518_v32, 4  ;;  %v1526_v29 = vrot.slane %v1525_v33, 4  ;;  %v1533_v37 = vrot.slane %v1532_v34, 4 }
 0x680   : > { %v1539_v38 = vsel %vm1510_vm5, %v1506_v13, 0.0  ;;  %v1546_v39 = vsel %vm1510_vm5, %v1507_v17, 0.0  ;;  %v1553_v40 = vsel %vm1510_vm5, %v1508_v18, 0.0  ;;  %v1560_v41 = vsel %vm1510_vm5, %v1509_v26, 0.0 }
 0x681   : > { %v1513_v42 = vadd.f32 %v1512_v35, %v1511_v30  ;;  %v1520_v43 = vadd.f32 %v1519_v22, %v1518_v32  ;;  %v1527_v44 = vadd.f32 %v1526_v29, %v1525_v33  ;;  %v1534_v47 = vadd.f32 %v1533_v37, %v1532_v34 }
 0x682   : > { %v1540_v48 = vrot.slane %v1539_v38, 4  ;;  %v1547_v49 = vrot.slane %v1546_v39, 4  ;;  %v1554_v50 = vrot.slane %v1553_v40, 4  ;;  %v1561_v51 = vrot.slane %v1560_v41, 4 }
 0x683   : > { %v1514_v52 = vrot.slane %v1513_v42, 2  ;;  %v1521_v53 = vrot.slane %v1520_v43, 2  ;;  %v1528_v54 = vrot.slane %v1527_v44, 2  ;;  %v1535_v55 = vrot.slane %v1534_v47, 2 }
 0x684   : > { %v1541_v56 = vadd.f32 %v1540_v48, %v1539_v38  ;;  %v1548_v5 = vadd.f32 %v1547_v49, %v1546_v39  ;;  %v1555_v31 = vadd.f32 %v1554_v50, %v1553_v40  ;;  %v1562_v57 = vadd.f32 %v1561_v51, %v1560_v41 }
 0x685   : > { %v1515_v58 = vadd.f32 %v1514_v52, %v1513_v42  ;;  %v1522_v59 = vadd.f32 %v1521_v53, %v1520_v43  ;;  %v1529_v60 = vadd.f32 %v1528_v54, %v1527_v44  ;;  %v1536_v61 = vadd.f32 %v1535_v55, %v1534_v47 }
 0x686   : > { %v1542_v62 = vrot.slane %v1541_v56, 2  ;;  %v1549_v63 = vrot.slane %v1548_v5, 2  ;;  %v1556_v0 = vrot.slane %v1555_v31, 2  ;;  %v1563_v1 = vrot.slane %v1562_v57, 2 }
 0x687   : > { %v1516_v4 = vrot.slane %v1515_v58, 1  ;;  %v1523_v6 = vrot.slane %v1522_v59, 1  ;;  %v1530_v7 = vrot.slane %v1529_v60, 1  ;;  %v1537_v8 = vrot.slane %v1536_v61, 1 }
 0x688   : > { %v1543_v9 = vadd.f32 %v1542_v62, %v1541_v56  ;;  %v1550_v12 = vadd.f32 %v1549_v63, %v1548_v5  ;;  %v1557_v14 = vadd.f32 %v1556_v0, %v1555_v31  ;;  %v1564_v16 = vadd.f32 %v1563_v1, %v1562_v57 }
 0x689   : > { %v1517_v20 = vadd.f32 %v1516_v4, %v1515_v58  ;;  %v1524_v21 = vadd.f32 %v1523_v6, %v1522_v59  ;;  %v1531_v23 = vadd.f32 %v1530_v7, %v1529_v60  ;;  %v1538_v25 = vadd.f32 %v1537_v8, %v1536_v61 }
 0x68a   : > { %v1544_v13 = vrot.slane %v1543_v9, 1  ;;  %v1551_v17 = vrot.slane %v1550_v12, 1  ;;  %v1558_v18 = vrot.slane %v1557_v14, 1  ;;  %v1565_v26 = vrot.slane %v1564_v16, 1 }
 0x68b   : > { %v2131_v30 = vmul.f32 -0.125, %v1517_v20  ;;  %v2132_v32 = vmul.f32 -0.125, %v1524_v21  ;;  %v2133_v33 = vmul.f32 -0.125, %v1531_v23  ;;  %v2134_v34 = vmul.f32 -0.125, %v1538_v25 }
 0x68c   : > { %v1545_v35 = vadd.f32 %v1544_v13, %v1543_v9  ;;  %v1552_v22 = vadd.f32 %v1551_v17, %v1550_v12  ;;  %v1559_v29 = vadd.f32 %v1558_v18, %v1557_v14  ;;  %v1566_v37 = vadd.f32 %v1565_v26, %v1564_v16 }
 0x68d   : > { %v1583_v38 = vmul.f32 1.442695, %v2131_v30  ;;  %v1585_v39 = vmul.f32 1.442695, %v2132_v32  ;;  %v1587_v40 = vmul.f32 1.442695, %v2133_v33 }
 0x68e   : > { %v2135_v41 = vmul.f32 -0.125, %v1545_v35  ;;  %v2136_v42 = vmul.f32 -0.125, %v1552_v22  ;;  %v2137_v43 = vmul.f32 -0.125, %v1559_v29  ;;  %v2138_v44 = vmul.f32 -0.125, %v1566_v37 }
 0x68f   : > { %2325 = vpow2.f32 %v1583_v38  ;;  %v1589_v47 = vmul.f32 1.442695, %v2134_v34 }
 0x690   : > { %2327 = vpow2.f32 %v1585_v39  ;;  %v1591_v48 = vmul.f32 1.442695, %v2135_v41  ;;  %v1593_v49 = vmul.f32 1.442695, %v2136_v42  ;;  %v1595_v50 = vmul.f32 1.442695, %v2137_v43 }
 0x691   : > { %2329 = vpow2.f32 %v1587_v40  ;;  %v1597_v51 = vmul.f32 1.442695, %v2138_v44 }
 0x692   : > { %2331 = vpow2.f32 %v1589_v47 }
 0x693   : > { %2333 = vpow2.f32 %v1591_v48 }
 0x694   : > { %2335 = vpow2.f32 %v1593_v49 }
 0x695   : > { %2337 = vpow2.f32 %v1595_v50 }
 0x696   : > { %2339 = vpow2.f32 %v1597_v51 }
 0x699   : > { %v2326_v52 = vpop.eup %2325 }
 0x69a   : > { %v2328_v53 = vpop.eup %2327  ;;  %v1599_v54 = vadd.f32 1.0, %v2326_v52 }
 0x69b   : > { %v2330_v55 = vpop.eup %2329  ;;  %v1600_v56 = vadd.f32 1.0, %v2328_v53 }
 0x69c   : > { %v2332_v5 = vpop.eup %2331  ;;  %v1601_v31 = vadd.f32 1.0, %v2330_v55  ;;  %2341 = vrcp.f32 %v1599_v54 }
 0x69d   : > { %v2334_v57 = vpop.eup %2333  ;;  %v1602_v58 = vadd.f32 1.0, %v2332_v5  ;;  %2343 = vrcp.f32 %v1600_v56 }
 0x69e   : > { %v2336_v59 = vpop.eup %2335  ;;  %v1603_v60 = vadd.f32 1.0, %v2334_v57  ;;  %2345 = vrcp.f32 %v1601_v31 }
 0x69f   : > { %v2338_v61 = vpop.eup %2337  ;;  %v1604_v62 = vadd.f32 1.0, %v2336_v59  ;;  %2347 = vrcp.f32 %v1602_v58 }
 0x6a0   : > { %v2340_v63 = vpop.eup %2339  ;;  %v1605_v0 = vadd.f32 1.0, %v2338_v61  ;;  %2349 = vrcp.f32 %v1603_v60 }
 0x6a1   : > { %v1606_v1 = vadd.f32 1.0, %v2340_v63  ;;  %2351 = vrcp.f32 %v1604_v62 }
 0x6a2   : > { %2353 = vrcp.f32 %v1605_v0 }
 0x6a3   : > { %2355 = vrcp.f32 %v1606_v1 }
 0x6a6   : > { %v3061_v4 = vpop.eup %2341 }
 0x6a7   : > { %v3063_v6 = vpop.eup %2343 }
 0x6a8   : > { %v3065_v7 = vpop.eup %2345  ;;  %v1632_v8 = vsel %vm1631_vm6, %v3063_v6, %v3061_v4 }
 0x6a9   : > { %v3070_v9 = vpop.eup %2347  ;;  %v1634_v12 = vsel %vm1633_vm7, %v3065_v7, %v1632_v8 }
 0x6aa   : > { %v3074_v14 = vpop.eup %2349  ;;  %v1636_v16 = vsel %vm1635_vm8, %v3070_v9, %v1634_v12 }
 0x6ab   : > { %v3078_v20 = vpop.eup %2351  ;;  %v1638_v21 = vsel %vm1637_vm9, %v3074_v14, %v1636_v16 }
 0x6ac   : > { %v3082_v23 = vpop.eup %2353  ;;  %v1640_v25 = vsel %vm1639_vm10, %v3078_v20, %v1638_v21 }
 0x6ad   : > { %v3086_v13 = vpop.eup %2355  ;;  %v1642_v17 = vsel %vm1641_vm11, %v3082_v23, %v1640_v25 }
 0x6ae   : > { %v1644_v18 = vsel %vm1643_vm12, %v3086_v13, %v1642_v17 }
 0x6af   : > { %v1646_v26 = vsel %vm1510_vm5, %v1644_v18, -inf }
 0x6b0   : > { %1647 = vmax.xlane.f32.xlu1 %v1646_v26 }
 0x6ed   : > { %v1147_v30 = vpop.xlane.xlu1 %1146 }
 0x6ee   : > { %2357 = vrcp.f32 %v1147_v30  ;;  %v1144_v32 = vpop.xlane.xlu0 %1143 }
 0x6ef   : > { %2359 = vrcp.f32 %v1144_v32 }
 0x6f2   : > { %v1150_v33 = vpop.xlane.xlu0 %1149 }
 0x6f3   : > { %2361 = vrcp.f32 %v1150_v33 }
 0x6f6   : > { %v1153_v34 = vpop.xlane.xlu0 %1152 }
 0x6f7   : > { %2363 = vrcp.f32 %v1153_v34 }
 0x6f8   : > { %v2358_v35 = vpop.eup %2357 }
 0x6f9   : > { %v1156_v22 = vpop.xlane.xlu1 %1155  ;;  %v3094_v29 = vmul.f32 %v2358_v35, %v3001_v11  ;;  %v2360_v37 = vpop.eup %2359 }
 0x6fa   : > { %2365 = vrcp.f32 %v1156_v22  ;;  %v3097_v38 = vmul.f32 %v2360_v37, %v3003_v15 }
 0x6fb   : > { %v1185_v39 = vsel %vm492_vm0, %v3094_v29, -inf }
 0x6fc   : > { %1186 = vmax.xlane.f32.xlu1 %v1185_v39  ;;  %v1182_v40 = vsel %vm492_vm0, %v3097_v38, -inf }
 0x6fd   : > { %v1162_v41 = vpop.xlane.xlu1 %1161  ;;  %v2362_v42 = vpop.eup %2361  ;;  %1183 = vmax.xlane.f32.xlu0 %v1182_v40 }
 0x6fe   : > { %v1159_v43 = vpop.xlane.xlu0 %1158  ;;  %2367 = vrcp.f32 %v1162_v41  ;;  %v3104_v11 = vmul.f32 %v2362_v42, %v3010_v10 }
 0x6ff   : > { %2369 = vrcp.f32 %v1159_v43 }
 0x700   : > { %v1188_v15 = vsel %vm492_vm0, %v3104_v11, -inf  ;;  %v1798_v49 = vcombine.low %v3097_v38, %v3104_v11  ;;  %v1799_v51 = vcombine.high %v3097_v38, %v3104_v11 }
 0x701   : > { %v2364_v44 = vpop.eup %2363  ;;  %1189 = vmax.xlane.f32.xlu0 %v1188_v15 }
 0x702   : > { %v1165_v47 = vpop.xlane.xlu0 %1164  ;;  %v3109_v48 = vmul.f32 %v2364_v44, %v3015_v27  ;;  %v1806_v55 = vrot.slane %v1798_v49, %v2942_v2 }
 0x703   : > { %2371 = vrcp.f32 %v1165_v47 }
 0x704   : > { %v2366_v50 = vpop.eup %2365  ;;  %v1191_v10 = vsel %vm492_vm0, %v3109_v48, -inf  ;;  %v1814_v53 = vcombine.low %v3094_v29, %v3109_v48  ;;  %v1815_v27 = vcombine.high %v3094_v29, %v3109_v48 }
 0x705   : > { %v3118_v52 = vmul.f32 %v2366_v50, %v3019_v28  ;;  %1192 = vmax.xlane.f32.xlu1 %v1191_v10  ;;  %v1813_v28 = vrot.slane %v1799_v51, %v2942_v2 }
 0x706   : > { %v1822_v56 = vrot.slane %v1814_v53, %v2942_v2  ;;  %v1829_v5 = vrot.slane %v1815_v27, %v2942_v2 }
 0x707   : > { %v1194_v54 = vsel %vm492_vm0, %v3118_v52, -inf }
 0x708   : > { %v2368_v31 = vpop.eup %2367  ;;  %1195 = vmax.xlane.f32.xlu0 %v1194_v54  ;;  %v1863_v59 = vcombine.high %v1806_v55, %v1822_v56  ;;  %v1879_v61 = vcombine.high %v1813_v28, %v1829_v5  ;;  %v1862_v21 = vcombine.low %v1806_v55, %v1822_v56  ;;  %v1878_v26 = vcombine.low %v1813_v28, %v1829_v5 }
 0x709   : > { %v2370_v57 = vpop.eup %2369  ;;  %v3131_v58 = vmul.f32 %v2368_v31, %v3023_v24 }
 0x70a   : > { %v3134_v60 = vmul.f32 %v2370_v57, %v3025_v36  ;;  %v3158_v35 = vrot.slane %v1862_v21, %v2955_v19  ;;  %v3161_v22 = vrot.slane %v1863_v59, %v2955_v19  ;;  %v3176_v41 = vrot.slane %v1878_v26, %v2955_v19 }
 0x70b   : > { %v1200_v62 = vsel %vm492_vm0, %v3131_v58, -inf  ;;  %v1830_v24 = vcombine.low %v3118_v52, %v3131_v58  ;;  %v1831_v36 = vcombine.high %v3118_v52, %v3131_v58  ;;  %v3179_v42 = vrot.slane %v1879_v61, %v2955_v19 }
 0x70c   : > { %v1197_v63 = vsel %vm492_vm0, %v3134_v60, -inf  ;;  %1201 = vmax.xlane.f32.xlu0 %v1200_v62 }
 0x70d   : > { %v2372_v0 = vpop.eup %2371  ;;  %1198 = vmax.xlane.f32.xlu1 %v1197_v63  ;;  %v1845_v17 = vrot.slane %v1831_v36, %v2942_v2 }
 0x70e   : > { %v3141_v1 = vmul.f32 %v2372_v0, %v3034_v45  ;;  %v1838_v45 = vrot.slane %v1830_v24, %v2942_v2 }
 0x710   : > { %v1203_v8 = vsel %vm492_vm0, %v3141_v1, -inf  ;;  %v1846_v12 = vcombine.low %v3134_v60, %v3141_v1  ;;  %v1847_v16 = vcombine.high %v3134_v60, %v3141_v1 }
 0x711   : > { %1204 = vmax.xlane.f32.xlu1 %v1203_v8 }
 0x712   : > { %v1854_v25 = vrot.slane %v1846_v12, %v2942_v2  ;;  %v1861_v18 = vrot.slane %v1847_v16, %v2942_v2 }
 0x714   : > { %v1894_v30 = vcombine.low %v1838_v45, %v1854_v25  ;;  %v1895_v32 = vcombine.high %v1838_v45, %v1854_v25  ;;  %v1910_v33 = vcombine.low %v1845_v17, %v1861_v18  ;;  %v1911_v34 = vcombine.high %v1845_v17, %v1861_v18 }
 0x716   : > { %v3164_v37 = vrot.slane %v1894_v30, %v2955_v19  ;;  %v3167_v39 = vrot.slane %v1895_v32, %v2955_v19  ;;  %v3170_v40 = vrot.slane %v1910_v33, %v2955_v19  ;;  %v3173_v2 = vrot.slane %v1911_v34, %v2955_v19 }
 0x718   : > { %v1926_v43 = vcombine.low %v3158_v35, %v3164_v37  ;;  %v1929_v15 = vcombine.high %v3161_v22, %v3167_v39  ;;  %v1928_v44 = vcombine.low %v3161_v22, %v3167_v39  ;;  %v1933_v47 = vcombine.high %v3179_v42, %v3173_v2 }
 0x719   : > { %v1930_v49 = vcombine.low %v3176_v41, %v3170_v40  ;;  %v1932_v50 = vcombine.low %v3179_v42, %v3173_v2 }
 0x73d   : > { %v3193_v19 = vpop.xlane.xlu1 %1647 }
 0x73e   : > { %v1650_v51 = vrot.slane %v3193_v19, 1  ;;  %v1651_v10 = vrot.slane %v3193_v19, 2  ;;  %v1652_v27 = vrot.slane %v3193_v19, 3  ;;  %vm1665_vm15 = vcmp.eq.f32.partialorder %v3061_v4, %v3193_v19 }
 0x73f   : > { %v1653_v56 = vrot.slane %v3193_v19, 4  ;;  %v1673_v5 = vsel %vm1665_vm15, %v2932_v46, 2  ;;  %v1655_v59 = vrot.slane %v3193_v19, 6  ;;  %v1656_v24 = vrot.slane %v3193_v19, 7 }
 0x740   : > { %vm1666_vm13 = vcmp.eq.f32.partialorder %v3063_v6, %v1650_v51  ;;  %vm1667_vm14 = vcmp.eq.f32.partialorder %v3065_v7, %v1651_v10  ;;  %vm1668_vm1 = vcmp.eq.f32.partialorder %v3070_v9, %v1652_v27  ;;  %v1654_v6 = vrot.slane %v3193_v19, 5 }
 0x741   : > { %v1674_v53 = vsel %vm1666_vm13, %v2932_v46, 2  ;;  %v1675_v54 = vsel %vm1667_vm14, %v2932_v46, 2  ;;  %vm3210_vm2 = vcmp.eq.f32.partialorder %v3074_v14, %v1653_v56  ;;  %v1676_v4 = vsel %vm1668_vm1, %v2932_v46, 2 }
 0x742   : > { %v1681_v55 = vrot.slane %v1674_v53, 7  ;;  %v1683_v31 = vrot.slane %v1675_v54, 6  ;;  %vm3220_vm13 = vcmp.eq.f32.partialorder %v3078_v20, %v1654_v6  ;;  %v1677_v14 = vsel %vm3210_vm2, %v2932_v46, 2 }
 0x743   : > { %v1685_v0 = vrot.slane %v1676_v4, 5  ;;  %vm3239_vm15 = vcmp.eq.f32.partialorder %v3082_v23, %v1655_v59  ;;  %v1687_v21 = vrot.slane %v1677_v14, 4  ;;  %vm3249_vm2 = vcmp.eq.f32.partialorder %v3086_v13, %v1656_v24 }
 0x744   : > { %v1682_v7 = vsel %vm1631_vm6, %v1681_v55, %v1673_v5  ;;  %v1679_v32 = vsel %vm3239_vm15, %v2932_v46, 2  ;;  %v1680_v10 = vsel %vm3249_vm2, %v2932_v46, 2 }
 0x745   : > { %v1684_v9 = vsel %vm1633_vm7, %v1683_v31, %v1682_v7  ;;  %v1691_v53 = vrot.slane %v1679_v32, 2 }
 0x746   : > { %v1686_v20 = vsel %vm1635_vm8, %v1685_v0, %v1684_v9 }
 0x747   : > { %v1688_v23 = vsel %vm1637_vm9, %v1687_v21, %v1686_v20 }
 0x789   : > { %v1187_v57 = vpop.xlane.xlu1 %1186 }
 0x78a   : > { %vm1209_vm4 = vcmp.eq.f32.partialorder %v3094_v29, %v1187_v57  ;;  %v1184_v61 = vpop.xlane.xlu0 %1183 }
 0x78b   : > { %v1217_v62 = vsel %vm1209_vm4, %v2932_v46, 64  ;;  %vm1208_vm14 = vcmp.eq.f32.partialorder %v3097_v38, %v1184_v61  ;;  %v1678_v38 = vsel %vm3220_vm13, %v2932_v46, 2 }
 0x78c   : > { %v3229_v29 = vsel %vm492_vm0, %v1217_v62, 2147483647  ;;  %v1216_v36 = vsel %vm1208_vm14, %v2932_v46, 64  ;;  %v1689_v33 = vrot.slane %v1678_v38, 3 }
 0x78d   : > { %v1241_v8 = vshra.s32 %v3229_v29, 16  ;;  %v3236_v12 = vsel %vm492_vm0, %v1216_v36, 2147483647  ;;  %v1240_v21 = vand.u32 65535, %v3229_v29 }
 0x78e   : > { %v1190_v45 = vpop.xlane.xlu0 %1189  ;;  %v1226_v25 = vshra.s32 %v3236_v12, 16  ;;  %v1690_v13 = vsel %vm1639_vm10, %v1689_v33, %v1688_v23 }
 0x78f   : > { %v1243_v17 = vcvt.s32.f32 %v1241_v8  ;;  %vm1210_vm1 = vcmp.eq.f32.partialorder %v3104_v11, %v1190_v45  ;;  %v1692_v5 = vsel %vm1641_vm11, %v1691_v53, %v1690_v13  ;;  %v1225_v45 = vand.u32 65535, %v3236_v12 }
 0x790   : > { %v1218_v26 = vsel %vm1210_vm1, %v2932_v46, 64  ;;  %v1228_v30 = vcvt.s32.f32 %v1226_v25  ;;  %v1242_v18 = vcvt.s32.f32 %v1240_v21 }
 0x791   : > { %1244 = vmin.xlane.f32.xlu1 %v1243_v17  ;;  %v1254_v34 = vsel %vm492_vm0, %v1218_v26, 2147483647  ;;  %v1227_v32 = vcvt.s32.f32 %v1225_v45 }
 0x792   : > { %1229 = vmin.xlane.f32.xlu0 %v1228_v30  ;;  %v1193_v11 = vpop.xlane.xlu1 %1192  ;;  %v1256_v51 = vshra.s32 %v1254_v34, 16  ;;  %v1255_v33 = vand.u32 65535, %v1254_v34 }
 0x793   : > { %vm1211_vm4 = vcmp.eq.f32.partialorder %v3109_v48, %v1193_v11  ;;  %v1693_v48 = vrot.slane %v1680_v10, 1 }
 0x794   : > { %v1219_v27 = vsel %vm1211_vm4, %v2932_v46, 64  ;;  %v1258_v55 = vcvt.s32.f32 %v1256_v51  ;;  %v1257_v29 = vcvt.s32.f32 %v1255_v33 }
 0x795   : > { %v1196_v54 = vpop.xlane.xlu0 %1195  ;;  %v1269_v56 = vsel %vm492_vm0, %v1219_v27, 2147483647  ;;  %v1694_v59 = vsel %vm1643_vm12, %v1693_v48, %v1692_v5 }
 0x796   : > { %vm1212_vm13 = vcmp.eq.f32.partialorder %v3118_v52, %v1196_v54  ;;  %1259 = vmin.xlane.f32.xlu0 %v1258_v55  ;;  %v1271_v6 = vshra.s32 %v1269_v56, 16  ;;  %v1695_v14 = vsel %vm1510_vm5, %v1694_v59, 2147483647  ;;  %v1270_v13 = vand.u32 65535, %v1269_v56 }
 0x797   : > { %v1220_v31 = vsel %vm1212_vm13, %v2932_v46, 64 }
 0x798   : > { %v1284_v7 = vsel %vm492_vm0, %v1220_v31, 2147483647  ;;  %v1273_v4 = vcvt.s32.f32 %v1271_v6  ;;  %v1696_v6 = vand.u32 65535, %v1695_v14 }
 0x799   : > { %v1202_v28 = vpop.xlane.xlu0 %1201  ;;  %v1286_v57 = vshra.s32 %v1284_v7, 16  ;;  %v1285_v10 = vand.u32 65535, %v1284_v7 }
 0x79a   : > { %vm1214_vm14 = vcmp.eq.f32.partialorder %v3131_v58, %v1202_v28  ;;  %v1199_v9 = vpop.xlane.xlu1 %1198  ;;  %1274 = vmin.xlane.f32.xlu1 %v1273_v4  ;;  %v1697_v58 = vshra.s32 %v1695_v14, 16 }
 0x79b   : > { %v1222_v61 = vsel %vm1214_vm14, %v2932_v46, 64  ;;  %vm1213_vm15 = vcmp.eq.f32.partialorder %v3134_v60, %v1199_v9  ;;  %v1288_v52 = vcvt.s32.f32 %v1286_v57  ;;  %v1927_v60 = vcombine.high %v3158_v35, %v3164_v37 }
 0x79c   : > { %v1314_v62 = vsel %vm492_vm0, %v1222_v61, 2147483647  ;;  %v1221_v63 = vsel %vm1213_vm15, %v2932_v46, 64  ;;  %v1699_v16 = vcvt.s32.f32 %v1697_v58  ;;  %v1698_v9 = vcvt.s32.f32 %v1696_v6 }
 0x79d   : > { %v1299_v0 = vsel %vm492_vm0, %v1221_v63, 2147483647  ;;  %1289 = vmin.xlane.f32.xlu0 %v1288_v52  ;;  %v1316_v24 = vshra.s32 %v1314_v62, 16  ;;  %v1315_v54 = vand.u32 65535, %v1314_v62 }
 0x79e   : > { %v1301_v36 = vshra.s32 %v1299_v0, 16  ;;  %v1205_v38 = vpop.xlane.xlu1 %1204  ;;  %v1300_v5 = vand.u32 65535, %v1299_v0  ;;  %v1931_v0 = vcombine.high %v3176_v41, %v3170_v40 }
 0x79f   : > { %v1318_v8 = vcvt.s32.f32 %v1316_v24  ;;  %vm1215_vm13 = vcmp.eq.f32.partialorder %v3141_v1, %v1205_v38  ;;  %v1317_v48 = vcvt.s32.f32 %v1315_v54 }
 0x7a0   : > { %v1303_v20 = vcvt.s32.f32 %v1301_v36  ;;  %v1302_v28 = vcvt.s32.f32 %v1300_v5 }
 0x7a1   : > { %1319 = vmin.xlane.f32.xlu0 %v1318_v8 }
 0x7a2   : > { %1304 = vmin.xlane.f32.xlu1 %v1303_v20 }
 0x7a5   : > { %1700 = vmin.xlane.f32.xlu0 %v1699_v16 }
 0x7bb   : > { %1935 = vrot.lane.b32.xlu0 %v1927_v60, %s2530_s20 }
 0x81e   : > { %v3283_v25 = vpop.xlane.xlu1 %1244 }
 0x81f   : > { %vm1246_vm5 = vcmp.eq.f32.partialorder %v1243_v17, %v3283_v25  ;;  %v3286_v23 = vpop.xlane.xlu0 %1229  ;;  %v1272_v17 = vcvt.s32.f32 %v1270_v13  ;;  %v1251_v21 = vcvt.f32.s32 %v3283_v25 }
 0x820   : > { %v1247_v26 = vsel %vm1246_vm5, %v1242_v18, inf  ;;  %vm1231_vm1 = vcmp.eq.f32.partialorder %v1228_v30, %v3286_v23  ;;  %v1287_v30 = vcvt.s32.f32 %v1285_v10  ;;  %v1236_v18 = vcvt.f32.s32 %v3286_v23 }
 0x821   : > { %1248 = vmin.xlane.f32.xlu0 %v1247_v26  ;;  %v1232_v11 = vsel %vm1231_vm1, %v1227_v32, inf  ;;  %v1252_v26 = vshll.u32 %v1251_v21, 16 }
 0x823   : > { %v3289_v51 = vpop.xlane.xlu0 %1259 }
 0x824   : > { %vm1261_vm2 = vcmp.eq.f32.partialorder %v1258_v55, %v3289_v51  ;;  %v1223_v55 = vsel %vm1215_vm13, %v2932_v46, 64  ;;  %v1266_v13 = vcvt.f32.s32 %v3289_v51 }
 0x825   : > { %v1262_v12 = vsel %vm1261_vm2, %v1257_v29, inf  ;;  %v1329_v1 = vsel %vm492_vm0, %v1223_v55, 2147483647 }
 0x826   : > { %v1331_v61 = vshra.s32 %v1329_v1, 16  ;;  %v1267_v54 = vshll.u32 %v1266_v13, 16 }
 0x827   : > { %v3292_v53 = vpop.xlane.xlu1 %1274 }
 0x828   : > { %vm1276_vm4 = vcmp.eq.f32.partialorder %v1273_v4, %v3292_v53  ;;  %v1333_v14 = vcvt.s32.f32 %v1331_v61  ;;  %v1281_v33 = vcvt.f32.s32 %v3292_v53 }
 0x829   : > { %v1277_v34 = vsel %vm1276_vm4, %v1272_v17, inf }
 0x82a   : > { %v3296_v27 = vpop.xlane.xlu0 %1289  ;;  %1278 = vmin.xlane.f32.xlu0 %v1277_v34 }
 0x82b   : > { %vm1291_vm14 = vcmp.eq.f32.partialorder %v1288_v52, %v3296_v27  ;;  %v1296_v23 = vcvt.f32.s32 %v3296_v27 }
 0x82c   : > { %v1292_v56 = vsel %vm1291_vm14, %v1287_v30, inf }
 0x82e   : > { %v3300_v31 = vpop.xlane.xlu0 %1319 }
 0x82f   : > { %v3302_v7 = vpop.xlane.xlu1 %1304  ;;  %vm1321_vm15 = vcmp.eq.f32.partialorder %v1318_v8, %v3300_v31 }
 0x830   : > { %vm1306_vm5 = vcmp.eq.f32.partialorder %v1303_v20, %v3302_v7  ;;  %v1322_v4 = vsel %vm1321_vm15, %v1317_v48, inf  ;;  %v1311_v34 = vcvt.f32.s32 %v3302_v7 }
 0x831   : > { %v1307_v57 = vsel %vm1306_vm5, %v1302_v28, inf  ;;  %v1297_v28 = vshll.u32 %v1296_v23, 16 }
 0x832   : > { %1308 = vmin.xlane.f32.xlu0 %v1307_v57  ;;  %v1701_v59 = vpop.xlane.xlu0 %1700 }
 0x833   : > { %vm1702_vm1 = vcmp.eq.f32.partialorder %v1699_v16, %v1701_v59  ;;  %v1707_v35 = vcvt.f32.s32 %v1701_v59 }
 0x834   : > { %v1703_v52 = vsel %vm1702_vm1, %v1698_v9, inf }
 0x835   : > { %1704 = vmin.xlane.f32.xlu1 %v1703_v52  ;;  %v1708_v24 = vshll.u32 %v1707_v35, 16 }
 0x836   : > { %v1936_v62 = vpop.permute.xlu0 %1935 }
 0x837   : > { %v1950_v63 = vsel %vm492_vm0, %v1926_v43, %v1936_v62  ;;  %v1330_v43 = vand.u32 65535, %v1329_v1  ;;  %v1312_v1 = vshll.u32 %v1311_v34, 16 }
 0x838   : > { %1954 = vst [vmem:[%s2937_s22] sm:$0xff] %v1950_v63 }
 0x839   : > { %1334 = vmin.xlane.f32.xlu1 %v1333_v14 }
 0x84a   : > { %1939 = vrot.lane.b32.xlu1 %v1929_v15, %s2530_s20  ;;  %v1332_v15 = vcvt.s32.f32 %v1330_v43 }
 0x86e   : > { %1233 = vmin.xlane.f32.xlu1 %v1232_v11 }
 0x872   : > { %1263 = vmin.xlane.f32.xlu1 %v1262_v12  ;;  %v1282_v12 = vshll.u32 %v1281_v33, 16 }
 0x876   : > { %1293 = vmin.xlane.f32.xlu1 %v1292_v56 }
 0x87a   : > { %1323 = vmin.xlane.f32.xlu1 %v1322_v4 }
 0x88b   : > { %1943 = vrot.lane.b32.xlu1 %v1931_v0, %s2530_s20 }
 0x8ae   : > { %v1249_v38 = vpop.xlane.xlu0 %1248 }
 0x8af   : > { %v1250_v45 = vcvt.f32.s32 %v1249_v38 }
 0x8b1   : > { %v1253_v11 = vadd.s32 %v1252_v26, %v1250_v45 }
 0x8b3   : > { %v1345_v10 = vcvt.s32.f32 %v1253_v11 }
 0x8b7   : > { %v1279_v32 = vpop.xlane.xlu0 %1278 }
 0x8b8   : > { %v1280_v22 = vcvt.f32.s32 %v1279_v32 }
 0x8ba   : > { %v1283_v30 = vadd.s32 %v1282_v12, %v1280_v22 }
 0x8bc   : > { %v1347_v4 = vcvt.s32.f32 %v1283_v30 }
 0x8bf   : > { %v1309_v25 = vpop.xlane.xlu0 %1308 }
 0x8c0   : > { %v1310_v55 = vcvt.f32.s32 %v1309_v25 }
 0x8c2   : > { %v1705_v37 = vpop.xlane.xlu1 %1704  ;;  %v1313_v7 = vadd.s32 %v1312_v1, %v1310_v55 }
 0x8c3   : > { %v1706_v36 = vcvt.f32.s32 %v1705_v37 }
 0x8c4   : > { %v1349_v37 = vcvt.s32.f32 %v1313_v7 }
 0x8c5   : > { %v3319_v8 = vadd.s32 %v1708_v24, %v1706_v36 }
 0x8c6   : > { %v3321_v58 = vpop.xlane.xlu1 %1334 }
 0x8c7   : > { %vm1336_vm2 = vcmp.eq.f32.partialorder %v1333_v14, %v3321_v58 }
 0x8c8   : > { %v1337_v20 = vsel %vm1336_vm2, %v1332_v15, inf }
 0x8c9   : > { %1338 = vmin.xlane.f32.xlu0 %v1337_v20 }
 0x8ca   : > { %v1940_v16 = vpop.permute.xlu1 %1939 }
 0x8cb   : > { %v1951_v60 = vsel %vm492_vm0, %v1928_v44, %v1940_v16  ;;  %v1237_v44 = vshll.u32 %v1236_v18, 16  ;;  %v1341_v18 = vcvt.f32.s32 %v3321_v58  ;;  %v1710_v58 = vcvt.s32.f32 %v3319_v8 }
 0x8cc   : > { %1955 = vst [vmem:[%s2937_s22 + $0x8] sm:$0xff] %v1951_v60 }
 0x8cd   : > { %v1342_v32 = vshll.u32 %v1341_v18, 16 }
 0x8df   : > { %1947 = vrot.lane.b32.xlu0 %v1933_v47, %s2530_s20  ;;  %v1755_v47 = vsub.s32 %v2932_v46, %v2886_v3  ;;  %v1326_v46 = vcvt.f32.s32 %v3300_v31  ;;  %s1976_s20 = sshll.u32 %s2937_s22, 4  ;;  %s3370_s20 = int_to_ptr.vmem [resolvable:$true] %s1976_s20 }
 0x8e0   : > { %s2446_s10 = scalar_lea.vmem %s3370_s20, 896  ;;  %p2453_p9 = scmp.lt.s32.totalorder %s3370_s20, %s2451_s12 }
 0x8e1   : > { %v1760_v6 = vrot.slane %v1345_v10, %v1755_v47  ;;  %v1768_v52 = vrot.slane %v1347_v4, %v1755_v47  ;;  %v1327_v63 = vshll.u32 %v1326_v46, 16  ;;  %v1776_v60 = vrot.slane %v1349_v37, %v1755_v47  ;;  %p2447_p1 = scmp.ne.s32.totalorder %s3370_s20, %s2446_s10  ;;  %p2454_p11 = scmp.lt.s32.totalorder %s2452_s23, %s2446_s10 }
 0x8e3   : > { %p2448_p4 = pnand %p2447_p1, %p3448_p5  ;;  %p2455_p0 = por %p2454_p11, %p2453_p9 }
 0x8e5   : > { %p2449_p6 = pneg %p2448_p4 }
 0x8e7   : > { %p2456_p2 = pnand %p2455_p0, %p2449_p6 }
 0x8fb   : > { %v1234_v39 = vpop.xlane.xlu1 %1233 }
 0x8fc   : > { %v1235_v29 = vcvt.f32.s32 %v1234_v39 }
 0x8fe   : > { %v1238_v17 = vadd.s32 %v1237_v44, %v1235_v29 }
 0x8ff   : > { %v1264_v53 = vpop.xlane.xlu1 %1263 }
 0x900   : > { %v1344_v5 = vcvt.s32.f32 %v1238_v17  ;;  %v1265_v56 = vcvt.f32.s32 %v1264_v53 }
 0x902   : > { %v1756_v51 = vrot.slane %v1344_v5, %v1755_v47  ;;  %v1268_v48 = vadd.s32 %v1267_v54, %v1265_v56 }
 0x903   : > { %v1294_v3 = vpop.xlane.xlu1 %1293 }
 0x904   : > { %v1785_v57 = vsel %vm1631_vm6, %v1760_v6, %v1756_v51  ;;  %v1346_v27 = vcvt.s32.f32 %v1268_v48  ;;  %v1295_v59 = vcvt.f32.s32 %v1294_v3  ;;  %vm1793_vm6 = vcmask 64512  }
 0x906   : > { %v1764_v9 = vrot.slane %v1346_v27, %v1755_v47  ;;  %v1298_v61 = vadd.s32 %v1297_v28, %v1295_v59 }
 0x907   : > { %v1324_v62 = vpop.xlane.xlu1 %1323 }
 0x908   : > { %v1786_v14 = vsel %vm1633_vm7, %v1764_v9, %v1785_v57  ;;  %v1348_v0 = vcvt.s32.f32 %v1298_v61  ;;  %v1325_v35 = vcvt.f32.s32 %v1324_v62  ;;  %vm1796_vm7 = vcmask 195584  }
 0x909   : > { %v1787_v43 = vsel %vm1635_vm8, %v1768_v52, %v1786_v14 }
 0x90a   : > { %v1772_v24 = vrot.slane %v1348_v0, %v1755_v47  ;;  %v1328_v31 = vadd.s32 %v1327_v63, %v1325_v35 }
 0x90b   : > { %v1944_v36 = vpop.permute.xlu1 %1943 }
 0x90c   : > { %v1788_v15 = vsel %vm1637_vm9, %v1772_v24, %v1787_v43  ;;  %v1350_v20 = vcvt.s32.f32 %v1328_v31  ;;  %v1952_v16 = vsel %vm492_vm0, %v1930_v49, %v1944_v36 }
 0x90d   : > { %1956 = vst [vmem:[%s2937_s22 + $0x10] sm:$0xff] %v1952_v16  ;;  %v1789_v21 = vsel %vm1639_vm10, %v1776_v60, %v1788_v15 }
 0x90e   : > { %v1780_v38 = vrot.slane %v1350_v20, %v1755_v47 }
 0x910   : > { %v1790_v45 = vsel %vm1641_vm11, %v1780_v38, %v1789_v21 }
 0x956   : > { %v1339_v26 = vpop.xlane.xlu0 %1338 }
 0x957   : > { %v1340_v33 = vcvt.f32.s32 %v1339_v26 }
 0x959   : > { %v1343_v11 = vadd.s32 %v1342_v32, %v1340_v33 }
 0x95a   : > { %v1948_v22 = vpop.permute.xlu0 %1947 }
 0x95b   : > { %v1351_v40 = vcvt.s32.f32 %v1343_v11  ;;  %v1953_v41 = vsel %vm492_vm0, %v1932_v50, %v1948_v22 }
 0x95c   : > { %1957 = vst [vmem:[%s2937_s22 + $0x18] sm:$0xff] %v1953_v41 }
 0x95d   : > { %v1784_v49 = vrot.slane %v1351_v40, %v1755_v47 }
 0x95f   : > { %v1791_v39 = vsel %vm1643_vm12, %v1784_v49, %v1790_v45 }
 0x960   : > { %v1794_v44 = vsel %vm1793_vm6, %v1791_v39, %v3193_v19 }
 0x961   : > { %v1795_v13 = vsel %vm594_vm3, %v1794_v44, %v1710_v58 }
 0x962   : > { %v1797_v2 = vsel %vm1796_vm7, %v1795_v13, 0.0 }
 0x963   : > { %1958 = vst [vmem:[%s2937_s22 + $0x20] sm:$0xff] %v1797_v2 }
 0x964   : > { %2459 = shalt.err (!%p2456_p2)
}
 0x965   : > { %s2460_s15 = scalar_lea.hbm %s3368_s16, 896  ;;  %s2464_s13 = scalar_lea.hbm %s3421_s8, 1792 }
 0x966   : > { %p2461_p7 = scmp.ne.s32.totalorder %s3368_s16, %s2460_s15  ;;  %p2465_p13 = scmp.lt.u32.totalorder %s3368_s16, %s3421_s8 }
 0x967   : > { %p2466_p8 = scmp.lt.u32.totalorder %s2464_s13, %s2460_s15  ;;  %p2468_p1 = scmp.lt.u32.totalorder %s2460_s15, %s3368_s16 }
 0x968   : > { %p2462_p12 = pnand %p2461_p7, %p3448_p5 }
 0x969   : > { %p2467_p10 = por %p2466_p8, %p2465_p13 }
 0x96a   : > { %p2463_p3 = pneg %p2462_p12 }
 0x96b   : > { %p2469_p4 = por %p2468_p1, %p2467_p10 }
 0x96d   : > { %p2470_p6 = pnand %p2469_p4, %p2463_p3 }
 0x96f   : > { %2473 = shalt.err (!%p2470_p6)
}
 0x970   : > { %2190 = dma.vmem_to_hbm [thread:$0]  (%p3448_p5), %s3370_s20, 896, %s3368_s16, %s1962_s9  }
 0x971 PF: > { %s1988_s14 = sand.u32 1, %s2508_s27   ;;  %p3449_p9 = scmp.ne.s32.totalorder %s3430_s18, 0 }
 0x972   : > { %p3450_p11 = scmp.ge.s32.totalorder %s2520_s30, 2  ;;  %s1989_s21 = scalar_lea.sflag [#allocation4], %s1988_s14 }
 0x974   : > { %p2204_p0 = pnand %p3450_p11, %p3449_p9 }
 0x976   : > { %2503 = dma.done.wait (!%p2204_p0), %s1989_s21, 896  }
 0x977   : > { %2505 = vsyncadd (!%p2204_p0), %s1989_s21, 4294966400  ;;  %s3451_s24 = sld [smem:[#allocation14_spill]]  ;;  %p23_p2 = scmp.ge.s32.totalorder %s2611_s11, 4  }
 0x978   : > { %s3452_s27 = smov %s2512_s28  ;;  %s3453_s28 = smov %s2516_s29 }
 0x979   : > { %s3455_s30 = smov %s2611_s11  ;;  %25 = sbr.rel (!%p23_p2) target bundleno = 9 (0x9), region = 109 }
 0x97d   : > { %s3454_s29 = smov %s3451_s24 }
 0x980   :  { %1994 = vsyncpa [#allocation3], 1 }
 0x981   :  { %1996 = vsyncpa [#allocation3 + $0x1], 1 }
 0x982   :  { %1997 = vsyncpa [#allocation8], 1 }
 0x983   :  { %1998 = vsyncpa [#allocation4], 1 }
 0x984   :  { %2000 = vsyncpa [#allocation4 + $0x1], 1 }
 0x985   :  { %2001 = vsyncpa [#allocation5], 1 }
 0x986   :  { %2003 = vsyncpa [#allocation5 + $0x1], 1 }

</bundles_post_ra>
